<compile_context>
chip_gen: v5e
topology: v5e:2x2
jax: 0.10.0
libtpu: 0.0.40
codegen_flags: <defaults>
</compile_context>

<pallas_src>
import jax
import jax.numpy as jnp
from jax import lax
from jax.experimental import pallas as pl
from jax.experimental.pallas import tpu as pltpu


def _bottleneck_kernel(x_ref, xtop_ref, xbot_ref,
                       w1_ref, b1_ref, w2_ref, b2_ref, w3_ref, b3_ref,
                       o_ref, z_buf):
    # x_ref    : (1, TH, W, Cin) bf16   current row tile
    # xtop_ref : (1, 1,  W, Cin) bf16   row just above the tile (clamped at top)
    # xbot_ref : (1, 1,  W, Cin) bf16   row just below the tile (clamped at bottom)
    # w1_ref   : (Cin, P)    bf16  conv1 1x1 weight, bn1 scale folded in
    # w2_ref   : (3, 3P, P)  bf16  conv2 3x3 weight, [dh, dw*P+i, o], bn2 folded
    # w3_ref   : (P, Cout)   bf16  conv3 1x1 weight, bn3 scale folded in
    # b*_ref   : (1, C)      f32   folded BN biases
    # o_ref    : (1, TH, W, Cout) bf16
    # z_buf    : (TH+2, W, 3P)    bf16 scratch: width-expanded conv1 activations
    r = pl.program_id(1)
    nr = pl.num_programs(1)
    TH = x_ref.shape[1]
    W = x_ref.shape[2]
    Cin = x_ref.shape[3]
    P = w1_ref.shape[1]
    Cout = w3_ref.shape[1]

    w1 = w1_ref[...]
    b1 = b1_ref[...]

    def conv1_expand(x_rows):
        """conv1+bn1+relu on R rows, returning the width-expanded (R, W, 3P) bf16
        buffer: channels [y1[:, c-1] | y1[:, c] | y1[:, c+1]] with zero at the
        left/right image border (conv2's width padding handled on the read side)."""
        R = x_rows.shape[0]
        y = jnp.dot(x_rows.reshape(R * W, Cin), w1,
                    preferred_element_type=jnp.float32)
        y = jnp.maximum(y + b1, 0.0).reshape(R, W, P)
        zc = jnp.zeros((R, 1, P), jnp.float32)
        y_l = jnp.concatenate([zc, y[:, :W - 1, :]], axis=1)   # y1[:, c-1]
        y_r = jnp.concatenate([y[:, 1:, :], zc], axis=1)       # y1[:, c+1]
        # TODO(synk): on lane-aligned production shapes, pltpu.roll + border mask
        #             would move these two column shifts onto the XLU.
        return jnp.concatenate([y_l, y, y_r], axis=-1).astype(jnp.bfloat16)

    # conv1 on the tile rows and on each halo row separately (no extended-tile
    # concat); every store below is a full-width, outer-dim-sliced write.
    z_buf[1:TH + 1] = conv1_expand(x_ref[0])
    z_buf[0:1] = conv1_expand(xtop_ref[0])
    z_buf[TH + 1:TH + 2] = conv1_expand(xbot_ref[0])

    # Halo rows outside the image are conv2 zero padding (zero in y1 space).
    @pl.when(r == 0)
    def _zero_top():
        z_buf[0:1] = jnp.zeros((1, W, 3 * P), jnp.bfloat16)

    @pl.when(r == nr - 1)
    def _zero_bot():
        z_buf[TH + 1:TH + 2] = jnp.zeros((1, W, 3 * P), jnp.bfloat16)

    # ---- conv2 (3x3, stride 1, pad 1): 3 matmuls over dh, K = 3P each --------
    acc = jnp.zeros((TH * W, P), jnp.float32)
    for dh in range(3):
        acc += jnp.dot(z_buf[dh:dh + TH].reshape(TH * W, 3 * P), w2_ref[dh],
                       preferred_element_type=jnp.float32)
    y2 = jnp.maximum(acc + b2_ref[...], 0.0)                     # (TH*W, P) f32

    # ---- conv3 (1x1) + bn3 + residual add + relu -----------------------------
    y3 = jnp.dot(y2.astype(jnp.bfloat16), w3_ref[...],
                 preferred_element_type=jnp.float32) + b3_ref[...]
    res = x_ref[0].reshape(TH * W, Cout).astype(jnp.float32)     # Cin == Cout
    out = jnp.maximum(y3 + res, 0.0)
    o_ref[0] = out.reshape(TH, W, Cout).astype(o_ref.dtype)


def fold_bottleneck_params(conv1_w, bn1, conv2_w, bn2, conv3_w, bn3, eps=1e-5):
    """Fold eval-mode BN into the conv weights and convert to kernel layout.

    conv*_w are PyTorch OIHW; bn* = (gamma, beta, running_mean, running_var).
    Returns (w1 (Cin,P) bf16, b1 (1,P) f32, w2 (3,3P,P) bf16, b2 (1,P) f32,
             w3 (P,Cout) bf16, b3 (1,Cout) f32).
    """
    def scale_bias(bn):
        gamma, beta, mean, var = bn
        s = gamma / jnp.sqrt(var + eps)
        return s, beta - mean * s

    s1, bias1 = scale_bias(bn1)
    s2, bias2 = scale_bias(bn2)
    s3, bias3 = scale_bias(bn3)

    # conv1: (P, Cin, 1, 1) -> (Cin, P); BN scale folded into output columns.
    w1 = jnp.transpose(conv1_w[:, :, 0, 0], (1, 0)) * s1[None, :]
    # conv2: OIHW (Pout, Pin, 3, 3) -> HWIO (3,3,Pin,Pout) -> (3, 3*Pin, Pout),
    # i.e. K index = dw*Pin + cin, matching the kernel's [left | center | right]
    # channel layout of the width-expanded buffer.
    pout, pin = conv2_w.shape[0], conv2_w.shape[1]
    w2 = jnp.transpose(conv2_w, (2, 3, 1, 0)) * s2[None, None, None, :]
    w2 = w2.reshape(3, 3 * pin, pout)
    # conv3: (Cout, P, 1, 1) -> (P, Cout).
    w3 = jnp.transpose(conv3_w[:, :, 0, 0], (1, 0)) * s3[None, :]

    bf = lambda a: a.astype(jnp.bfloat16)
    f32 = lambda a: a[None, :].astype(jnp.float32)
    return (bf(w1), f32(bias1), bf(w2), f32(bias2), bf(w3), f32(bias3))


def _pick_row_tile(H, N, target):
    """Largest divisor of H <= target, keeping >= 2 grid steps (v7x megacore)."""
    divisors = [d for d in range(1, H + 1) if H % d == 0]
    th = max(d for d in divisors if d <= max(1, target))
    if N * (H // th) < 2 and H > 1:
        th = max(d for d in divisors if d < H)
    return th


def bottleneck_forward(x_nhwc, params, *, row_tile=32):
    """Fused Bottleneck forward on NHWC / bf16 activations.

    x_nhwc: (N, H, W, Cin) bfloat16. Returns (N, H, W, Cout) bfloat16.
    Keeping the HBM round-trip in NHWC bf16 (no per-call transposes, half the
    bytes) is the dominant win: the op is HBM-bandwidth bound for real ResNet
    stages on v5e/v6e/v7x.
    """
    w1, b1, w2, b2, w3, b3 = params
    assert x_nhwc.dtype == jnp.bfloat16, "pass activations as bf16 NHWC"
    N, H, W, Cin = x_nhwc.shape
    P = w1.shape[1]
    Cout = w3.shape[1]
    assert Cin == Cout, "stride=1 / downsample=None requires inplanes == planes * expansion"
    assert w2.shape == (3, 3 * P, P)

    TH = _pick_row_tile(H, N, row_tile)
    R = H // TH

    # Grid-invariant blocks (weights/biases): constant index map, fetched once.
    # (pl.Buffered(1) could drop their second buffer; they are tiny, so skipped.)
    def full_spec(a):
        nd = a.ndim
        return pl.BlockSpec(a.shape, lambda b, r, _nd=nd: (0,) * _nd)

    in_specs = [
        pl.BlockSpec((1, TH, W, Cin), lambda b, r: (b, r, 0, 0)),
        pl.BlockSpec((1, 1, W, Cin),
                     lambda b, r: (b, jnp.maximum(r * TH - 1, 0), 0, 0)),
        pl.BlockSpec((1, 1, W, Cin),
                     lambda b, r: (b, jnp.minimum((r + 1) * TH, H - 1), 0, 0)),
        full_spec(w1), full_spec(b1),
        full_spec(w2), full_spec(b2),
        full_spec(w3), full_spec(b3),
    ]
    out_spec = pl.BlockSpec((1, TH, W, Cout), lambda b, r: (b, r, 0, 0))

    # Cost hint: conv FLOPs (incl. conv1 halo recompute) and bf16 activation /
    # weight traffic incl. the per-tile halo re-reads.
    flops = (2 * N * (H + 2 * R) * W * Cin * P
             + 2 * N * H * W * (9 * P * P + P * Cout))
    bytes_accessed = ((N * (H + 2 * R) * W * Cin + N * H * W * Cout) * 2
                      + (w1.size + w2.size + w3.size) * 2
                      + (b1.size + b2.size + b3.size) * 4)
    cost = pl.CostEstimate(flops=int(flops), transcendentals=0,
                           bytes_accessed=int(bytes_accessed))

    return pl.pallas_call(
        _bottleneck_kernel,
        out_shape=jax.ShapeDtypeStruct((N, H, W, Cout), jnp.bfloat16),
        grid_spec=pltpu.PrefetchScalarGridSpec(
            num_scalar_prefetch=0,
            grid=(N, R),
            in_specs=in_specs,
            out_specs=out_spec,
            scratch_shapes=[pltpu.VMEM((TH + 2, W, 3 * P), jnp.bfloat16)],
        ),
        compiler_params=pltpu.CompilerParams(
            dimension_semantics=("parallel", "parallel"),
            vmem_limit_bytes=32 * 1024 * 1024),
        cost_estimate=cost,
    )(x_nhwc, x_nhwc, x_nhwc, w1, b1, w2, b2, w3, b3)


def bottleneck_forward_nchw(x_nchw, params, *, row_tile=32):
    """PyTorch-layout convenience wrapper (NCHW in/out). Prefer the NHWC bf16
    entry point: these boundary transposes re-read/write the tensor in HBM."""
    x = jnp.transpose(x_nchw, (0, 2, 3, 1)).astype(jnp.bfloat16)
    out = bottleneck_forward(x, params, row_tile=row_tile)
    return jnp.transpose(out, (0, 3, 1, 2)).astype(x_nchw.dtype)


def _reference(x_nhwc, params):
    """Pure-JAX NHWC reference mirroring the kernel's bf16/f32 precision points."""
    w1, b1, w2, b2, w3, b3 = params
    N, H, W, Cin = x_nhwc.shape
    P = w1.shape[1]
    Cout = w3.shape[1]
    dn = ('NHWC', 'HWIO', 'NHWC')
    y = lax.conv_general_dilated(x_nhwc, w1.reshape(1, 1, Cin, P), (1, 1), 'VALID',
                                 dimension_numbers=dn,
                                 preferred_element_type=jnp.float32)
    y = jnp.maximum(y + b1[0], 0.0).astype(jnp.bfloat16)
    y = lax.conv_general_dilated(y, w2.reshape(3, 3, P, P), (1, 1), 'SAME',
                                 dimension_numbers=dn,
                                 preferred_element_type=jnp.float32)
    y = jnp.maximum(y + b2[0], 0.0).astype(jnp.bfloat16)
    y = lax.conv_general_dilated(y, w3.reshape(1, 1, P, Cout), (1, 1), 'VALID',
                                 dimension_numbers=dn,
                                 preferred_element_type=jnp.float32)
    y = y + b3[0] + x_nhwc.astype(jnp.float32)
    return jnp.maximum(y, 0.0).astype(jnp.bfloat16)


if __name__ == "__main__":
    # Small shapes consistent with the module defaults:
    # stride=1, downsample=None  =>  inplanes == planes * expansion (=4).
    N, H, W = 2, 16, 16
    planes = 4
    inplanes = planes * 4
    cout = planes * 4

    key = jax.random.PRNGKey(0)
    ks = jax.random.split(key, 8)

    # Activations carried in NHWC / bf16 (what the surrounding model would use).
    x = jax.random.normal(ks[0], (N, H, W, inplanes), jnp.float32).astype(jnp.bfloat16)

    # PyTorch-layout conv weights (OIHW, no bias).
    conv1_w = jax.random.normal(ks[1], (planes, inplanes, 1, 1), jnp.float32) * 0.1
    conv2_w = jax.random.normal(ks[2], (planes, planes, 3, 3), jnp.float32) * 0.1
    conv3_w = jax.random.normal(ks[3], (cout, planes, 1, 1), jnp.float32) * 0.1

    # Eval-mode BatchNorm statistics.
    def bn_stats(k, c):
        k1, k2, k3, k4 = jax.random.split(k, 4)
        gamma = 1.0 + 0.1 * jax.random.normal(k1, (c,), jnp.float32)
        beta = 0.1 * jax.random.normal(k2, (c,), jnp.float32)
        mean = 0.1 * jax.random.normal(k3, (c,), jnp.float32)
        var = jnp.abs(1.0 + 0.1 * jax.random.normal(k4, (c,), jnp.float32))
        return gamma, beta, mean, var

    bn1 = bn_stats(ks[4], planes)
    bn2 = bn_stats(ks[5], planes)
    bn3 = bn_stats(ks[6], cout)

    params = fold_bottleneck_params(conv1_w, bn1, conv2_w, bn2, conv3_w, bn3)

    out = jax.block_until_ready(bottleneck_forward(x, params, row_tile=8))
    ref = jax.block_until_ready(_reference(x, params))

    assert out.shape == (N, H, W, cout) and out.dtype == jnp.bfloat16
    out_f = out.astype(jnp.float32)
    ref_f = ref.astype(jnp.float32)
    max_err = jnp.max(jnp.abs(out_f - ref_f))
    assert jnp.allclose(out_f, ref_f, rtol=3e-2, atol=3e-2), f"max abs err {max_err}"

    print("KERNEL_OK")
</pallas_src>

<mosaic_0001>
module attributes {stable_mosaic.version = 11 : i64} {
  func.func @_bottleneck_kernel(%arg0: i32, %arg1: i32, %arg2: memref<1x8x16x16xbf16, #tpu.memory_space<vmem>>, %arg3: memref<1x1x16x16xbf16, #tpu.memory_space<vmem>>, %arg4: memref<1x1x16x16xbf16, #tpu.memory_space<vmem>>, %arg5: memref<16x4xbf16, #tpu.memory_space<vmem>>, %arg6: memref<1x4xf32, #tpu.memory_space<vmem>>, %arg7: memref<3x12x4xbf16, #tpu.memory_space<vmem>>, %arg8: memref<1x4xf32, #tpu.memory_space<vmem>>, %arg9: memref<4x16xbf16, #tpu.memory_space<vmem>>, %arg10: memref<1x16xf32, #tpu.memory_space<vmem>>, %arg11: memref<1x8x16x16xbf16, #tpu.memory_space<vmem>>, %arg12: memref<10x16x12xbf16, #tpu.memory_space<vmem>>) attributes {dimension_semantics = [#tpu.dimension_semantics<parallel>, #tpu.dimension_semantics<parallel>], iteration_bounds = array<i64: 2, 2>, scalar_prefetch = 0 : i64, scratch_operands = 1 : i64, tpu.core_type = #tpu.core_type<tc>, window_params = [{transform_indices = @transform_0, window_bounds = array<i64: 1, 8, 16, 16>}, {transform_indices = @transform_1, window_bounds = array<i64: 1, 1, 16, 16>}, {transform_indices = @transform_2, window_bounds = array<i64: 1, 1, 16, 16>}, {pipeline_mode = #tpu.pipeline_mode<synchronous>, transform_indices = @transform_3, window_bounds = array<i64: 16, 4>}, {pipeline_mode = #tpu.pipeline_mode<synchronous>, transform_indices = @transform_4, window_bounds = array<i64: 1, 4>}, {pipeline_mode = #tpu.pipeline_mode<synchronous>, transform_indices = @transform_5, window_bounds = array<i64: 3, 12, 4>}, {pipeline_mode = #tpu.pipeline_mode<synchronous>, transform_indices = @transform_6, window_bounds = array<i64: 1, 4>}, {pipeline_mode = #tpu.pipeline_mode<synchronous>, transform_indices = @transform_7, window_bounds = array<i64: 4, 16>}, {pipeline_mode = #tpu.pipeline_mode<synchronous>, transform_indices = @transform_8, window_bounds = array<i64: 1, 16>}, {transform_indices = @transform_9, window_bounds = array<i64: 1, 8, 16, 16>}]} {
    %c0 = arith.constant 0 : index
    %c0_0 = arith.constant 0 : index
    %0 = vector.load %arg5[%c0, %c0_0] : memref<16x4xbf16, #tpu.memory_space<vmem>>, vector<16x4xbf16>
    %c0_1 = arith.constant 0 : index
    %c0_2 = arith.constant 0 : index
    %1 = vector.load %arg6[%c0_1, %c0_2] : memref<1x4xf32, #tpu.memory_space<vmem>>, vector<1x4xf32>
    %c0_3 = arith.constant 0 : index
    %c0_4 = arith.constant 0 : index
    %c0_5 = arith.constant 0 : index
    %c0_6 = arith.constant 0 : index
    %2 = vector.load %arg2[%c0_3, %c0_4, %c0_5, %c0_6] : memref<1x8x16x16xbf16, #tpu.memory_space<vmem>>, vector<1x8x16x16xbf16>
    %3 = vector.shape_cast %2 : vector<1x8x16x16xbf16> to vector<8x16x16xbf16>
    %4 = vector.shape_cast %3 : vector<8x16x16xbf16> to vector<128x16xbf16>
    %cst = arith.constant dense<0.000000e+00> : vector<128x4xf32>
    %5 = tpu.matmul %4, %0, %cst {dimension_numbers = #tpu.dot_dimension_numbers<[1], [0], [0], [1], [0, 0, 1, 1], [], []>} : vector<128x16xbf16>, vector<16x4xbf16>, vector<128x4xf32> -> vector<128x4xf32>
    %6 = vector.broadcast %1 : vector<1x4xf32> to vector<128x4xf32>
    %7 = arith.addf %5, %6 : vector<128x4xf32>
    %cst_7 = arith.constant 0.000000e+00 : f32
    %8 = vector.broadcast %cst_7 : f32 to vector<128x4xf32>
    %9 = arith.maximumf %7, %8 : vector<128x4xf32>
    %10 = vector.shape_cast %9 : vector<128x4xf32> to vector<8x16x4xf32>
    %cst_8 = arith.constant 0.000000e+00 : f32
    %11 = vector.broadcast %cst_8 : f32 to vector<8x1x4xf32>
    %12 = vector.extract_strided_slice %10 {offsets = [0, 0, 0], sizes = [8, 15, 4], strides = [1, 1, 1]} : vector<8x16x4xf32> to vector<8x15x4xf32>
    %13 = tpu.concatenate %11, %12 in 1 : vector<8x1x4xf32>, vector<8x15x4xf32> -> vector<8x16x4xf32>
    %14 = vector.extract_strided_slice %10 {offsets = [0, 1, 0], sizes = [8, 15, 4], strides = [1, 1, 1]} : vector<8x16x4xf32> to vector<8x15x4xf32>
    %15 = tpu.concatenate %14, %11 in 1 : vector<8x15x4xf32>, vector<8x1x4xf32> -> vector<8x16x4xf32>
    %16 = tpu.concatenate %13, %10, %15 in 2 : vector<8x16x4xf32>, vector<8x16x4xf32>, vector<8x16x4xf32> -> vector<8x16x12xf32>
    %17 = arith.truncf %16 : vector<8x16x12xf32> to vector<8x16x12xbf16>
    %c1 = arith.constant 1 : index
    %c0_9 = arith.constant 0 : index
    %c0_10 = arith.constant 0 : index
    %18 = vector.load %arg12[%c1, %c0_9, %c0_10] : memref<10x16x12xbf16, #tpu.memory_space<vmem>>, vector<8x16x12xbf16>
    tpu.vector_store %arg12[%c1, %c0_9, %c0_10], %17 {strides = array<i32>} : memref<10x16x12xbf16, #tpu.memory_space<vmem>>, vector<8x16x12xbf16>,
    %c0_11 = arith.constant 0 : index
    %c0_12 = arith.constant 0 : index
    %c0_13 = arith.constant 0 : index
    %c0_14 = arith.constant 0 : index
    %19 = vector.load %arg3[%c0_11, %c0_12, %c0_13, %c0_14] : memref<1x1x16x16xbf16, #tpu.memory_space<vmem>>, vector<1x1x16x16xbf16>
    %20 = vector.shape_cast %19 : vector<1x1x16x16xbf16> to vector<1x16x16xbf16>
    %21 = vector.shape_cast %20 : vector<1x16x16xbf16> to vector<16x16xbf16>
    %cst_15 = arith.constant dense<0.000000e+00> : vector<16x4xf32>
    %22 = tpu.matmul %21, %0, %cst_15 {dimension_numbers = #tpu.dot_dimension_numbers<[1], [0], [0], [1], [0, 0, 1, 1], [], []>} : vector<16x16xbf16>, vector<16x4xbf16>, vector<16x4xf32> -> vector<16x4xf32>
    %23 = vector.broadcast %1 : vector<1x4xf32> to vector<16x4xf32>
    %24 = arith.addf %22, %23 : vector<16x4xf32>
    %cst_16 = arith.constant 0.000000e+00 : f32
    %25 = vector.broadcast %cst_16 : f32 to vector<16x4xf32>
    %26 = arith.maximumf %24, %25 : vector<16x4xf32>
    %27 = vector.shape_cast %26 : vector<16x4xf32> to vector<1x16x4xf32>
    %cst_17 = arith.constant 0.000000e+00 : f32
    %28 = vector.broadcast %cst_17 : f32 to vector<1x1x4xf32>
    %29 = vector.extract_strided_slice %27 {offsets = [0, 0, 0], sizes = [1, 15, 4], strides = [1, 1, 1]} : vector<1x16x4xf32> to vector<1x15x4xf32>
    %30 = tpu.concatenate %28, %29 in 1 : vector<1x1x4xf32>, vector<1x15x4xf32> -> vector<1x16x4xf32>
    %31 = vector.extract_strided_slice %27 {offsets = [0, 1, 0], sizes = [1, 15, 4], strides = [1, 1, 1]} : vector<1x16x4xf32> to vector<1x15x4xf32>
    %32 = tpu.concatenate %31, %28 in 1 : vector<1x15x4xf32>, vector<1x1x4xf32> -> vector<1x16x4xf32>
    %33 = tpu.concatenate %30, %27, %32 in 2 : vector<1x16x4xf32>, vector<1x16x4xf32>, vector<1x16x4xf32> -> vector<1x16x12xf32>
    %34 = arith.truncf %33 : vector<1x16x12xf32> to vector<1x16x12xbf16>
    %c0_18 = arith.constant 0 : index
    %c0_19 = arith.constant 0 : index
    %c0_20 = arith.constant 0 : index
    %35 = vector.load %arg12[%c0_18, %c0_19, %c0_20] : memref<10x16x12xbf16, #tpu.memory_space<vmem>>, vector<1x16x12xbf16>
    tpu.vector_store %arg12[%c0_18, %c0_19, %c0_20], %34 {strides = array<i32>} : memref<10x16x12xbf16, #tpu.memory_space<vmem>>, vector<1x16x12xbf16>,
    %c0_21 = arith.constant 0 : index
    %c0_22 = arith.constant 0 : index
    %c0_23 = arith.constant 0 : index
    %c0_24 = arith.constant 0 : index
    %36 = vector.load %arg4[%c0_21, %c0_22, %c0_23, %c0_24] : memref<1x1x16x16xbf16, #tpu.memory_space<vmem>>, vector<1x1x16x16xbf16>
    %37 = vector.shape_cast %36 : vector<1x1x16x16xbf16> to vector<1x16x16xbf16>
    %38 = vector.shape_cast %37 : vector<1x16x16xbf16> to vector<16x16xbf16>
    %cst_25 = arith.constant dense<0.000000e+00> : vector<16x4xf32>
    %39 = tpu.matmul %38, %0, %cst_25 {dimension_numbers = #tpu.dot_dimension_numbers<[1], [0], [0], [1], [0, 0, 1, 1], [], []>} : vector<16x16xbf16>, vector<16x4xbf16>, vector<16x4xf32> -> vector<16x4xf32>
    %40 = vector.broadcast %1 : vector<1x4xf32> to vector<16x4xf32>
    %41 = arith.addf %39, %40 : vector<16x4xf32>
    %cst_26 = arith.constant 0.000000e+00 : f32
    %42 = vector.broadcast %cst_26 : f32 to vector<16x4xf32>
    %43 = arith.maximumf %41, %42 : vector<16x4xf32>
    %44 = vector.shape_cast %43 : vector<16x4xf32> to vector<1x16x4xf32>
    %cst_27 = arith.constant 0.000000e+00 : f32
    %45 = vector.broadcast %cst_27 : f32 to vector<1x1x4xf32>
    %46 = vector.extract_strided_slice %44 {offsets = [0, 0, 0], sizes = [1, 15, 4], strides = [1, 1, 1]} : vector<1x16x4xf32> to vector<1x15x4xf32>
    %47 = tpu.concatenate %45, %46 in 1 : vector<1x1x4xf32>, vector<1x15x4xf32> -> vector<1x16x4xf32>
    %48 = vector.extract_strided_slice %44 {offsets = [0, 1, 0], sizes = [1, 15, 4], strides = [1, 1, 1]} : vector<1x16x4xf32> to vector<1x15x4xf32>
    %49 = tpu.concatenate %48, %45 in 1 : vector<1x15x4xf32>, vector<1x1x4xf32> -> vector<1x16x4xf32>
    %50 = tpu.concatenate %47, %44, %49 in 2 : vector<1x16x4xf32>, vector<1x16x4xf32>, vector<1x16x4xf32> -> vector<1x16x12xf32>
    %51 = arith.truncf %50 : vector<1x16x12xf32> to vector<1x16x12xbf16>
    %c9 = arith.constant 9 : index
    %c0_28 = arith.constant 0 : index
    %c0_29 = arith.constant 0 : index
    %52 = vector.load %arg12[%c9, %c0_28, %c0_29] : memref<10x16x12xbf16, #tpu.memory_space<vmem>>, vector<1x16x12xbf16>
    tpu.vector_store %arg12[%c9, %c0_28, %c0_29], %51 {strides = array<i32>} : memref<10x16x12xbf16, #tpu.memory_space<vmem>>, vector<1x16x12xbf16>,
    %c0_i32 = arith.constant 0 : i32
    %53 = arith.cmpi eq, %arg1, %c0_i32 : i32
    %54 = arith.extui %53 : i1 to i32
    %c0_i32_30 = arith.constant 0 : i32
    %55 = arith.cmpi ne, %54, %c0_i32_30 : i32
    scf.if %55 {
      %cst_70 = arith.constant 0.000000e+00 : bf16
      %101 = vector.broadcast %cst_70 : bf16 to vector<1x16x12xbf16>
      %c0_71 = arith.constant 0 : index
      %c0_72 = arith.constant 0 : index
      %c0_73 = arith.constant 0 : index
      %102 = vector.load %arg12[%c0_71, %c0_72, %c0_73] : memref<10x16x12xbf16, #tpu.memory_space<vmem>>, vector<1x16x12xbf16>
      tpu.vector_store %arg12[%c0_71, %c0_72, %c0_73], %101 {strides = array<i32>} : memref<10x16x12xbf16, #tpu.memory_space<vmem>>, vector<1x16x12xbf16>,
    } else {
    }
    %c1_i32 = arith.constant 1 : i32
    %56 = arith.cmpi eq, %arg1, %c1_i32 : i32
    %57 = arith.extui %56 : i1 to i32
    %c0_i32_31 = arith.constant 0 : i32
    %58 = arith.cmpi ne, %57, %c0_i32_31 : i32
    scf.if %58 {
      %cst_70 = arith.constant 0.000000e+00 : bf16
      %101 = vector.broadcast %cst_70 : bf16 to vector<1x16x12xbf16>
      %c9_71 = arith.constant 9 : index
      %c0_72 = arith.constant 0 : index
      %c0_73 = arith.constant 0 : index
      %102 = vector.load %arg12[%c9_71, %c0_72, %c0_73] : memref<10x16x12xbf16, #tpu.memory_space<vmem>>, vector<1x16x12xbf16>
      tpu.vector_store %arg12[%c9_71, %c0_72, %c0_73], %101 {strides = array<i32>} : memref<10x16x12xbf16, #tpu.memory_space<vmem>>, vector<1x16x12xbf16>,
    } else {
    }
    %cst_32 = arith.constant 0.000000e+00 : f32
    %59 = vector.broadcast %cst_32 : f32 to vector<128x4xf32>
    %c0_33 = arith.constant 0 : index
    %c0_34 = arith.constant 0 : index
    %c0_35 = arith.constant 0 : index
    %60 = vector.load %arg12[%c0_33, %c0_34, %c0_35] : memref<10x16x12xbf16, #tpu.memory_space<vmem>>, vector<8x16x12xbf16>
    %61 = vector.shape_cast %60 : vector<8x16x12xbf16> to vector<128x12xbf16>
    %c0_36 = arith.constant 0 : index
    %c0_37 = arith.constant 0 : index
    %c0_38 = arith.constant 0 : index
    %62 = vector.load %arg7[%c0_36, %c0_37, %c0_38] : memref<3x12x4xbf16, #tpu.memory_space<vmem>>, vector<1x12x4xbf16>
    %63 = vector.shape_cast %62 : vector<1x12x4xbf16> to vector<12x4xbf16>
    %cst_39 = arith.constant dense<0.000000e+00> : vector<128x4xf32>
    %64 = tpu.matmul %61, %63, %cst_39 {dimension_numbers = #tpu.dot_dimension_numbers<[1], [0], [0], [1], [0, 0, 1, 1], [], []>} : vector<128x12xbf16>, vector<12x4xbf16>, vector<128x4xf32> -> vector<128x4xf32>
    %65 = arith.addf %59, %64 : vector<128x4xf32>
    %c1_40 = arith.constant 1 : index
    %c0_41 = arith.constant 0 : index
    %c0_42 = arith.constant 0 : index
    %66 = vector.load %arg12[%c1_40, %c0_41, %c0_42] : memref<10x16x12xbf16, #tpu.memory_space<vmem>>, vector<8x16x12xbf16>
    %67 = vector.shape_cast %66 : vector<8x16x12xbf16> to vector<128x12xbf16>
    %c1_43 = arith.constant 1 : index
    %c0_44 = arith.constant 0 : index
    %c0_45 = arith.constant 0 : index
    %68 = vector.load %arg7[%c1_43, %c0_44, %c0_45] : memref<3x12x4xbf16, #tpu.memory_space<vmem>>, vector<1x12x4xbf16>
    %69 = vector.shape_cast %68 : vector<1x12x4xbf16> to vector<12x4xbf16>
    %cst_46 = arith.constant dense<0.000000e+00> : vector<128x4xf32>
    %70 = tpu.matmul %67, %69, %cst_46 {dimension_numbers = #tpu.dot_dimension_numbers<[1], [0], [0], [1], [0, 0, 1, 1], [], []>} : vector<128x12xbf16>, vector<12x4xbf16>, vector<128x4xf32> -> vector<128x4xf32>
    %71 = arith.addf %65, %70 : vector<128x4xf32>
    %c2 = arith.constant 2 : index
    %c0_47 = arith.constant 0 : index
    %c0_48 = arith.constant 0 : index
    %72 = vector.load %arg12[%c2, %c0_47, %c0_48] : memref<10x16x12xbf16, #tpu.memory_space<vmem>>, vector<8x16x12xbf16>
    %73 = vector.shape_cast %72 : vector<8x16x12xbf16> to vector<128x12xbf16>
    %c2_49 = arith.constant 2 : index
    %c0_50 = arith.constant 0 : index
    %c0_51 = arith.constant 0 : index
    %74 = vector.load %arg7[%c2_49, %c0_50, %c0_51] : memref<3x12x4xbf16, #tpu.memory_space<vmem>>, vector<1x12x4xbf16>
    %75 = vector.shape_cast %74 : vector<1x12x4xbf16> to vector<12x4xbf16>
    %cst_52 = arith.constant dense<0.000000e+00> : vector<128x4xf32>
    %76 = tpu.matmul %73, %75, %cst_52 {dimension_numbers = #tpu.dot_dimension_numbers<[1], [0], [0], [1], [0, 0, 1, 1], [], []>} : vector<128x12xbf16>, vector<12x4xbf16>, vector<128x4xf32> -> vector<128x4xf32>
    %77 = arith.addf %71, %76 : vector<128x4xf32>
    %c0_53 = arith.constant 0 : index
    %c0_54 = arith.constant 0 : index
    %78 = vector.load %arg8[%c0_53, %c0_54] : memref<1x4xf32, #tpu.memory_space<vmem>>, vector<1x4xf32>
    %79 = vector.broadcast %78 : vector<1x4xf32> to vector<128x4xf32>
    %80 = arith.addf %77, %79 : vector<128x4xf32>
    %cst_55 = arith.constant 0.000000e+00 : f32
    %81 = vector.broadcast %cst_55 : f32 to vector<128x4xf32>
    %82 = arith.maximumf %80, %81 : vector<128x4xf32>
    %83 = arith.truncf %82 : vector<128x4xf32> to vector<128x4xbf16>
    %c0_56 = arith.constant 0 : index
    %c0_57 = arith.constant 0 : index
    %84 = vector.load %arg9[%c0_56, %c0_57] : memref<4x16xbf16, #tpu.memory_space<vmem>>, vector<4x16xbf16>
    %cst_58 = arith.constant dense<0.000000e+00> : vector<128x16xf32>
    %85 = tpu.matmul %83, %84, %cst_58 {dimension_numbers = #tpu.dot_dimension_numbers<[1], [0], [0], [1], [0, 0, 1, 1], [], []>} : vector<128x4xbf16>, vector<4x16xbf16>, vector<128x16xf32> -> vector<128x16xf32>
    %c0_59 = arith.constant 0 : index
    %c0_60 = arith.constant 0 : index
    %86 = vector.load %arg10[%c0_59, %c0_60] : memref<1x16xf32, #tpu.memory_space<vmem>>, vector<1x16xf32>
    %87 = vector.broadcast %86 : vector<1x16xf32> to vector<128x16xf32>
    %88 = arith.addf %85, %87 : vector<128x16xf32>
    %c0_61 = arith.constant 0 : index
    %c0_62 = arith.constant 0 : index
    %c0_63 = arith.constant 0 : index
    %c0_64 = arith.constant 0 : index
    %89 = vector.load %arg2[%c0_61, %c0_62, %c0_63, %c0_64] : memref<1x8x16x16xbf16, #tpu.memory_space<vmem>>, vector<1x8x16x16xbf16>
    %90 = vector.shape_cast %89 : vector<1x8x16x16xbf16> to vector<8x16x16xbf16>
    %91 = vector.shape_cast %90 : vector<8x16x16xbf16> to vector<128x16xbf16>
    %92 = arith.extf %91 : vector<128x16xbf16> to vector<128x16xf32>
    %93 = arith.addf %88, %92 : vector<128x16xf32>
    %cst_65 = arith.constant 0.000000e+00 : f32
    %94 = vector.broadcast %cst_65 : f32 to vector<128x16xf32>
    %95 = arith.maximumf %93, %94 : vector<128x16xf32>
    %96 = vector.shape_cast %95 : vector<128x16xf32> to vector<8x16x16xf32>
    %97 = arith.truncf %96 : vector<8x16x16xf32> to vector<8x16x16xbf16>
    %c0_66 = arith.constant 0 : index
    %c0_67 = arith.constant 0 : index
    %c0_68 = arith.constant 0 : index
    %c0_69 = arith.constant 0 : index
    %98 = vector.load %arg11[%c0_66, %c0_67, %c0_68, %c0_69] : memref<1x8x16x16xbf16, #tpu.memory_space<vmem>>, vector<1x8x16x16xbf16>
    %99 = vector.shape_cast %98 : vector<1x8x16x16xbf16> to vector<8x16x16xbf16>
    %100 = vector.shape_cast %97 : vector<8x16x16xbf16> to vector<1x8x16x16xbf16>
    tpu.vector_store %arg11[%c0_66, %c0_67, %c0_68, %c0_69], %100 {strides = array<i32>} : memref<1x8x16x16xbf16, #tpu.memory_space<vmem>>, vector<1x8x16x16xbf16>,
    return
  }
  func.func @transform_0(%arg0: i32, %arg1: i32) -> (i32, i32, i32, i32) {
    %c0_i32 = arith.constant 0 : i32
    %c0_i32_0 = arith.constant 0 : i32
    %c0_i32_1 = arith.constant 0 : i32
    return %arg0, %arg1, %c0_i32, %c0_i32_0 : i32, i32, i32, i32
  }
  func.func @transform_1(%arg0: i32, %arg1: i32) -> (i32, i32, i32, i32) {
    %c8_i32 = arith.constant 8 : i32
    %0 = arith.muli %arg1, %c8_i32 : i32
    %c1_i32 = arith.constant 1 : i32
    %1 = arith.subi %0, %c1_i32 : i32
    %c0_i32 = arith.constant 0 : i32
    %2 = arith.maxsi %1, %c0_i32 : i32
    %c0_i32_0 = arith.constant 0 : i32
    %c0_i32_1 = arith.constant 0 : i32
    %c0_i32_2 = arith.constant 0 : i32
    return %arg0, %2, %c0_i32_0, %c0_i32_1 : i32, i32, i32, i32
  }
  func.func @transform_2(%arg0: i32, %arg1: i32) -> (i32, i32, i32, i32) {
    %c1_i32 = arith.constant 1 : i32
    %0 = arith.addi %arg1, %c1_i32 : i32
    %c8_i32 = arith.constant 8 : i32
    %1 = arith.muli %0, %c8_i32 : i32
    %c15_i32 = arith.constant 15 : i32
    %2 = arith.minsi %1, %c15_i32 : i32
    %c0_i32 = arith.constant 0 : i32
    %c0_i32_0 = arith.constant 0 : i32
    %c0_i32_1 = arith.constant 0 : i32
    return %arg0, %2, %c0_i32, %c0_i32_0 : i32, i32, i32, i32
  }
  func.func @transform_3(%arg0: i32, %arg1: i32) -> (i32, i32) {
    %c0_i32 = arith.constant 0 : i32
    %c0_i32_0 = arith.constant 0 : i32
    %c0_i32_1 = arith.constant 0 : i32
    return %c0_i32, %c0_i32_0 : i32, i32
  }
  func.func @transform_4(%arg0: i32, %arg1: i32) -> (i32, i32) {
    %c0_i32 = arith.constant 0 : i32
    %c0_i32_0 = arith.constant 0 : i32
    %c0_i32_1 = arith.constant 0 : i32
    return %c0_i32, %c0_i32_0 : i32, i32
  }
  func.func @transform_5(%arg0: i32, %arg1: i32) -> (i32, i32, i32) {
    %c0_i32 = arith.constant 0 : i32
    %c0_i32_0 = arith.constant 0 : i32
    %c0_i32_1 = arith.constant 0 : i32
    %c0_i32_2 = arith.constant 0 : i32
    return %c0_i32, %c0_i32_0, %c0_i32_1 : i32, i32, i32
  }
  func.func @transform_6(%arg0: i32, %arg1: i32) -> (i32, i32) {
    %c0_i32 = arith.constant 0 : i32
    %c0_i32_0 = arith.constant 0 : i32
    %c0_i32_1 = arith.constant 0 : i32
    return %c0_i32, %c0_i32_0 : i32, i32
  }
  func.func @transform_7(%arg0: i32, %arg1: i32) -> (i32, i32) {
    %c0_i32 = arith.constant 0 : i32
    %c0_i32_0 = arith.constant 0 : i32
    %c0_i32_1 = arith.constant 0 : i32
    return %c0_i32, %c0_i32_0 : i32, i32
  }
  func.func @transform_8(%arg0: i32, %arg1: i32) -> (i32, i32) {
    %c0_i32 = arith.constant 0 : i32
    %c0_i32_0 = arith.constant 0 : i32
    %c0_i32_1 = arith.constant 0 : i32
    return %c0_i32, %c0_i32_0 : i32, i32
  }
  func.func @transform_9(%arg0: i32, %arg1: i32) -> (i32, i32, i32, i32) {
    %c0_i32 = arith.constant 0 : i32
    %c0_i32_0 = arith.constant 0 : i32
    %c0_i32_1 = arith.constant 0 : i32
    return %arg0, %arg1, %c0_i32, %c0_i32_0 : i32, i32, i32, i32
  }
}

</mosaic_0001>

<bundles_post_ra>
// kernel: tpu_custom_call.1
= control target key start
LH: loop header
LB: loop body
LE: loop exit
PB: predicated region body
PF: predicated region fallthrough
CT: control target
= control target key end

     0   :  { %s3546_s0 = inlined_call_operand.hbm [shape: bf16[2,16,16,16], index: 0, kind: input, shape index: {}]   ;;  %s3547_s1 = inlined_call_operand.hbm [shape: bf16[2,16,16,16], index: 1, kind: input, shape index: {}]   ;;  %s3548_s2 = inlined_call_operand.hbm [shape: bf16[2,16,16,16], index: 2, kind: input, shape index: {}]   ;;  %s3549_s3 = inlined_call_operand.vmem [shape: bf16[16,4], index: 3, kind: input, shape index: {}]   ;;  %s3550_s4 = inlined_call_operand.vmem [shape: f32[1,4], index: 4, kind: input, shape index: {}]   ;;  %s3551_s5 = inlined_call_operand.vmem [shape: bf16[3,12,4], index: 5, kind: input, shape index: {}]   ;;  %s3552_s6 = inlined_call_operand.vmem [shape: f32[1,4], index: 6, kind: input, shape index: {}]   ;;  %s3553_s7 = inlined_call_operand.vmem [shape: bf16[4,16], index: 7, kind: input, shape index: {}]   ;;  %s3554_s8 = inlined_call_operand.vmem [shape: f32[1,16], index: 8, kind: input, shape index: {}]   ;;  %s3555_s9 = inlined_call_operand.hbm [shape: bf16[2,16,16,16], index: 9, kind: output, shape index: {}]  }
   0x1   :  { %3573 = sst [smem:[#allocation27_spill]] %s3546_s0 }
   0x2   :  { %3574 = sst [smem:[#allocation28_spill]] %s3547_s1 }
   0x3   :  { %3575 = sst [smem:[#allocation29_spill]] %s3549_s3 }
   0x4   :  { %3576 = sst [smem:[#allocation30_spill]] %s3550_s4 }
   0x5   :  { %3577 = sst [smem:[#allocation31_spill]] %s3551_s5 }
   0x6   :  { %3578 = sst [smem:[#allocation32_spill]] %s3552_s6 }
   0x7   :  { %3579 = sst [smem:[#allocation33_spill]] %s3553_s7 }
   0x8   :  { %3580 = sst [smem:[#allocation34_spill]] %s3554_s8 }
   0x9   :  { %3581 = sst [smem:[#allocation35_spill]] %s3555_s9 }
   0xa   :  { %14 = vsyncpa [#allocation4], 0 }
   0xb   :  { %16 = vsyncpa [#allocation4 + $0x1], 0 }
   0xc   :  { %17 = vsyncpa [#allocation7], 0 }
   0xd   :  { %19 = vsyncpa [#allocation7 + $0x1], 0 }
   0xe   :  { %20 = vsyncpa [#allocation5], 0 }
   0xf   :  { %22 = vsyncpa [#allocation5 + $0x1], 0  ;;  %s2758_s30 = smov 0   ;;  %s2760_s10 = smov 0  }
  0x10   :  { %s2762_s11 = smov 0   ;;  %s2764_s12 = smov 0  }
  0x11   :  { %s2766_s13 = smov 0   ;;  %s2768_s14 = smov 0  }
  0x12   :  { %s2770_s15 = smov 0   ;;  %s2772_s16 = smov 0  }
  0x13   :  { %s2774_s17 = smov 0   ;;  %s2776_s18 = smov 0  }
  0x14   :  { %s2778_s19 = smov 0   ;;  %s2780_s20 = smov 0  }
  0x15   :  { %s2782_s21 = smov 0   ;;  %s2784_s22 = smov 0  }
  0x16 LB: > { %3582 = sst [smem:[#allocation14_spill]] %s2667_s14  ;;  %s2829_s23 = sadd.s32 4294967295, %s2699_s22   ;;  %s2699_s22 = sphi %s2784_s22, %s28_s22   ;;  %s2695_s21 = sphi %s2782_s21, %s3635_s21   ;;  %s2691_s20 = sphi %s2780_s20, %s3634_s20   ;;  %s2687_s19 = sphi %s2778_s19, %s3633_s19   ;;  %s2683_s18 = sphi %s2776_s18, %s3632_s18   ;;  %s2679_s17 = sphi %s2774_s17, %s3631_s17   ;;  %s2675_s16 = sphi %s2772_s16, %s3642_s16   ;;  %s2671_s15 = sphi %s2770_s15, %s3641_s15   ;;  %s2667_s14 = sphi %s2768_s14, %s3629_s14   ;;  %s2663_s13 = sphi %s2766_s13, %s3640_s13   ;;  %s2659_s12 = sphi %s2764_s12, %s3639_s12   ;;  %s2655_s11 = sphi %s2762_s11, %s3638_s11   ;;  %s2651_s10 = sphi %s2760_s10, %s3637_s10   ;;  %s2647_s30 = sphi %s2758_s30, %s3636_s30  }
  0x17   : > { %3583 = sst [smem:[#allocation15_spill]] %s2671_s15  ;;  %s37_s24 = sadd.s32 1, %s2691_s20 }
  0x18   : > { %3584 = sst [smem:[#allocation16_spill]] %s2679_s17  ;;  %p38_p0 = scmp.ge.s32.totalorder %s37_s24, 2 }
  0x19   : > { %3585 = sst [smem:[#allocation17_spill]] %s2683_s18  ;;  %s40_s25 = sadd.s32 1, %s2695_s21 }
  0x1a   : > { %3586 = sst [smem:[#allocation18_spill]] %s2687_s19  ;;  %p57_p1 = scmp.eq.s32.totalorder %s2699_s22, 0 }
  0x1b   : > { %3587 = sst [smem:[#allocation19_spill]] %s2691_s20  ;;  %p63_p2 = scmp.eq.s32.totalorder %s2829_s23, 0 }
  0x1c   : > { %3588 = sst [smem:[#allocation20_spill]] %s2695_s21  ;;  %s3644_s24 = smov (%p38_p0, %s37_s24), 0 }
  0x1d   : > { %3589 = sst [smem:[#allocation21_spill]] %s3644_s24  ;;  %s3646_s25 = smov (!%p38_p0, %s40_s25), %s2695_s21 }
  0x1e   : > { %s45_s26 = ssub.s32 %s2691_s20, %s3644_s24  ;;  %s1886_s27 = sshll.u32 %s2691_s20, 3 }
  0x1f   : > { %p42_p3 = scmp.ge.s32.totalorder %s3646_s25, 2  ;;  %s1887_s28 = sadd.s32 4294967295, %s1886_s27 }
  0x20   : > { %p74_p4 = scmp.gt.s32.totalorder %s1887_s28, 0  ;;  %s1888_s29 = sshll.u32 %s3644_s24, 3 }
  0x21   : > { %s3648_s25 = smov (%p42_p3, %s3646_s25), 0  ;;  %s1889_s19 = sadd.s32 4294967295, %s1888_s29 }
  0x22   : > { %3590 = sst [smem:[#allocation22_spill]] %s3648_s25  ;;  %s3650_s28 = smov (!%p74_p4, %s1887_s28), 0 }
  0x23   : > { %s2846_s9 = ssub.s32 %s2695_s21, %s3648_s25  ;;  %p78_p5 = scmp.gt.s32.totalorder %s1889_s19, 0 }
  0x24   : > { %s2849_s8 = sor.u32 %s45_s26, %s2846_s9  ;;  %s85_s6 = sadd.s32 1, %s2667_s14 }
  0x25   : > { %p47_p6 = scmp.eq.s32.totalorder %s2849_s8, 0  ;;  %s3652_s19 = smov (!%p78_p5, %s1889_s19), 0 }
  0x26   : > { %p92_p7 = scmp.ne.s32.totalorder %s2667_s14, %s2663_s13  ;;  %p98_p8 = scmp.ne.s32.totalorder %s2663_s13, %s2659_s12 }
  0x27   : > { %s81_s24 = ssub.s32 %s3650_s28, %s3652_s19  ;;  %s2857_s25 = sadd.s32 8, %s1886_s27 }
  0x28   : > { %s82_s7 = sor.u32 %s81_s24, %s2846_s9  ;;  %p2862_p9 = por %p92_p7, %p57_p1 }
  0x29   : > { %p83_p10 = scmp.eq.s32.totalorder %s82_s7, 0  ;;  %p2868_p11 = por %p98_p8, %p63_p2 }
  0x2a   : > { %s2873_s12 = sadd.s32 8, %s1888_s29  ;;  %p3571_p0 = scmp.lt.s32.totalorder %s2699_s22, 4 }
  0x2b   : > { %s3592_s5 = scalar_select %p2868_p11, 1, 0 }
  0x2c   : > { %s2876_s19 = scalar_select %p83_p10, %s2667_s14, %s85_s6  }
  0x2d   : > { %3593 = sst [smem:[#allocation23_spill]] %s3592_s5  ;;  %s2881_s24 = sshll.u32 %s2695_s21, 5 }
  0x2e   : > { %3594 = sst [smem:[#allocation24_spill]] %s2876_s19  ;;  %s355_s7 = sand.u32 1, %s2699_s22  }
  0x2f   : > { %s357_s27 = sand.u32 1, %s2667_s14   ;;  %s1902_s4 = sshll.u32 %s3650_s28, 1 }
  0x30   : > { %s1899_s18 = sshll.u32 %s357_s27, 3  ;;  %s368_s3 = sadd.s32 %s1902_s4, %s2881_s24 }
  0x31   : > { %s359_s5 = scalar_lea.vmem [#allocation6], %s1899_s18  ;;  %s1904_s6 = sshll.u32 %s368_s3, 2 }
  0x32   : > { %s373_s29 = sshll.u32 %s359_s5, 4  ;;  %s3595_s1 = sld [smem:[#allocation28_spill]]  ;;  %s374_s29 = int_to_ptr.vmem [resolvable:$true] %s373_s29 }
  0x33   : > { %p2221_p3 = pnand %p3571_p0, %p2862_p9  ;;  %p1910_p4 = scmp.ge.s32.totalorder %s2699_s22, 1 }
  0x34   : > { %s2894_s5 = scalar_lea.sflag [#allocation7], %s355_s7  ;;  %s3564_s3 = smov 64  }
  0x35   : > { %s3566_s18 = smov 4   ;;  %p409_p5 = scmp.lt.s32.totalorder %s2699_s22, 5 }
  0x36   : > { %s49_s28 = sadd.s32 1, %s2679_s17  ;;  %p56_p8 = scmp.ne.s32.totalorder %s2679_s17, %s2675_s16 }
  0x37   : > { %p2901_p7 = pnand %p1910_p4, %p409_p5  ;;  %p62_p9 = scmp.ne.s32.totalorder %s2675_s16, %s2671_s15 }
  0x38   : > { %s370_s14 = scalar_lea.hbm %s3595_s1, %s1904_s6  ;;  %p286_p10 = scmp.eq.s32.totalorder %s2829_s23, 3 }
  0x39   : > { %s371_s4 = sshll.u32 %s370_s14, 4  ;;  %s1885_s14 = sadd.s32 4294967294, %s2699_s22   ;;  %s372_s4 = int_to_ptr.hbm [resolvable:$true] %s371_s4 }
  0x3a   : > { %2223 = dma.hbm_to_vmem [thread:$0]  (!%p2221_p3), %s372_s4, 128, %s374_s29, %s2894_s5, %s3564_s3, %s3564_s3, %s3566_s18  }
  0x3b   : > { %s2910_s26 = scalar_select %p47_p6, %s2679_s17, %s49_s28  }
  0x3c   : > { %p292_p13 = scmp.eq.s32.totalorder %s1885_s14, 3  ;;  %p2919_p12 = por %p57_p1, %p56_p8 }
  0x3d   : > { %3597 = sst [smem:[#allocation25_spill]] %s2910_s26  ;;  %p2925_p3 = por %p63_p2, %p62_p9 }
  0x3e   : > { %p2929_p4 = por %p286_p10, %p56_p8  ;;  %p2933_p6 = por %p292_p13, %p62_p9 }
  0x3f   : > { %s330_s29 = sand.u32 1, %s2679_s17   ;;  %s2126_s6 = sshll.u32 %s2691_s20, 4 }
  0x40   : > { %s3601_s27 = scalar_select %p2933_p6, 1, 0 }
  0x41   : > { %s1894_s4 = sshll.u32 %s330_s29, 6  ;;  %s340_s14 = sadd.s32 %s2126_s6, %s2881_s24 }
  0x42   : > { %3602 = sst [smem:[#allocation26_spill]] %s3601_s27  ;;  %s1898_s28 = sshll.u32 %s340_s14, 2 }
  0x43   : > { %s334_s3 = scalar_lea.vmem [#allocation3], %s1894_s4  ;;  %s3603_s0 = sld [smem:[#allocation27_spill]] }
  0x44   : > { %s345_s18 = sshll.u32 %s334_s3, 4  ;;  %p2218_p13 = pnand %p3571_p0, %p2919_p12  ;;  %s346_s18 = int_to_ptr.vmem [resolvable:$true] %s345_s18 }
  0x45   : > { %s331_s6 = scalar_lea.sflag [#allocation4], %s330_s29  ;;  %s3604_s20 = smov 4  }
  0x46   : > { %s3605_s14 = smov 64   ;;  %p3606_p5 = scmp.lt.s32.totalorder %s2857_s25, 15 }
  0x47   : > { %p3607_p8 = scmp.lt.s32.totalorder %s2873_s12, 15  ;;  %s121_s1 = sadd.s32 1, %s2655_s11 }
  0x48   : > { %s3654_s25 = smov (!%p3606_p5, %s2857_s25), 15  ;;  %p128_p9 = scmp.ne.s32.totalorder %s2655_s11, %s2651_s10 }
  0x49   : > { %s342_s27 = scalar_lea.hbm %s3603_s0, %s1898_s28  ;;  %s3656_s12 = smov (!%p3607_p8, %s2873_s12), 15 }
  0x4a   : > { %s343_s17 = sshll.u32 %s342_s27, 4  ;;  %s117_s3 = ssub.s32 %s3654_s25, %s3656_s12  ;;  %s344_s17 = int_to_ptr.hbm [resolvable:$true] %s343_s17 }
  0x4b   : > { %2220 = dma.hbm_to_vmem [thread:$0]  (!%p2218_p13), %s344_s17, 1024, %s346_s18, %s331_s6, %s3605_s14, %s3605_s14, %s3604_s20  }
  0x4c   : > { %p134_p10 = scmp.ne.s32.totalorder %s2651_s10, %s2647_s30  ;;  %s118_s26 = sor.u32 %s117_s3, %s2846_s9 }
  0x4d   : > { %p2964_p12 = por %p128_p9, %p57_p1  ;;  %p119_p0 = scmp.eq.s32.totalorder %s118_s26, 0 }
  0x4e   : > { %p2970_p13 = por %p134_p10, %p63_p2  ;;  %s385_s18 = sand.u32 1, %s2655_s11  }
  0x4f   : > { %s1907_s27 = sshll.u32 %s3654_s25, 1  ;;  %s1905_s30 = sshll.u32 %s385_s18, 3 }
  0x50   : > { %s2976_s29 = scalar_select %p119_p0, %s2655_s11, %s121_s1  }
  0x51   : > { %s396_s9 = sadd.s32 %s1907_s27, %s2881_s24  ;;  %s387_s3 = scalar_lea.vmem [#allocation8], %s1905_s30 }
  0x52   : > { %s1909_s12 = sshll.u32 %s396_s9, 2  ;;  %s401_s0 = sshll.u32 %s387_s3, 4  ;;  %s402_s0 = int_to_ptr.vmem [resolvable:$true] %s401_s0 }
  0x53   : > { %s398_s6 = scalar_lea.hbm %s3548_s2, %s1909_s12  ;;  %p3610_p1 = scmp.lt.s32.totalorder %s2699_s22, 4 }
  0x54   : > { %s399_s15 = sshll.u32 %s398_s6, 4  ;;  %413 = sbr.rel (%p2901_p7) target bundleno = 877 (0x36d), region = 56  ;;  %s400_s15 = int_to_ptr.hbm [resolvable:$true] %s399_s15 }
  0x55   : > { %p2224_p2 = pnand %p3610_p1, %p2964_p12  ;;  %s2993_s25 = sand.u32 (!%p2901_p7), 1, %s2675_s16  }
  0x56   : > { %s1911_s24 = sshll.u32 (!%p2901_p7), %s2993_s25, 6  ;;  %s416_s1 = scalar_lea.sflag (!%p2901_p7), [#allocation4], %s2993_s25 }
  0x57   : > { %2226 = dma.hbm_to_vmem [thread:$0]  (!%p2224_p2), %s400_s15, 128, %s402_s0, %s2894_s5, %s3605_s14, %s3605_s14, %s3604_s20  }
  0x58   : > { %s2999_s26 = scalar_lea.vmem (!%p2901_p7), [#allocation3], %s1911_s24 }
  0x59   : > { %2630 = dma.done.wait (%p2925_p3), %s416_s1, 1024  }
  0x5a   : > { %2632 = vsyncadd (%p2925_p3), %s416_s1, 4294966272  ;;  %s425_s15 = sand.u32 1, %s2829_s23   ;;  %s427_s20 = sand.u32 1, %s2663_s13  }
  0x5b   : > { %s3007_s5 = sshll.u32 %s427_s20, 3  ;;  %s426_s21 = scalar_lea.sflag [#allocation7], %s425_s15 }
  0x5c   : > { %s429_s14 = scalar_lea.vmem [#allocation6], %s3007_s5 }
  0x5d   : > { %2634 = dma.done.wait (%p2868_p11), %s426_s21, 128  }
  0x5e   : > { %2636 = vsyncadd (%p2868_p11), %s426_s21, 4294967168  ;;  %s437_s19 = sand.u32 1, %s2651_s10  }
  0x5f   : > { %s1913_s7 = sshll.u32 %s437_s19, 3 }
  0x60   : > { %s439_s18 = scalar_lea.vmem [#allocation8], %s1913_s7 }
  0x61   : > { %2638 = dma.done.wait (%p2970_p13), %s426_s21, 128  }
  0x62   : > { %2640 = vsyncadd (%p2970_p13), %s426_s21, 4294967168  ;;  %s3612_s30 = sld [smem:[#allocation29_spill]]  ;;  %v2130_v1 = vld [vmem:[%s2999_s26] sm:$0xff]  ;;  %v2133_v2 = vld [vmem:[%s2999_s26 + $0x18] sm:$0xff]  ;;  %vm564_vm0 = vcmask 130048   ;;  %vm670_vm1 = vcmask 1040384  }
  0x63   : > { %v2135_v3 = vld [vmem:[%s2999_s26 + $0x28] sm:$0xff]  ;;  %v2139_v4 = vld [vmem:[%s439_s18] sm:$0xff]  ;;  %v2134_v6 = vld [vmem:[%s2999_s26 + $0x20] sm:$0xff]  ;;  %s3613_s12 = sld [smem:[#allocation30_spill]]  ;;  %vm719_vm2 = vcmask 1046528   ;;  %s2703_s4 = smov 4  }
  0x64   : > { %v2131_v5 = vld [vmem:[%s2999_s26 + $0x8] sm:$0xff]  ;;  %v2136_v7 = vld [vmem:[%s2999_s26 + $0x30] sm:$0xff]  ;;  %v2137_v10 = vld [vmem:[%s2999_s26 + $0x38] sm:$0xff]  ;;  %s2704_s28 = smov 8   ;;  %vm864_vm3 = vcmask 31744   ;;  %vm881_vm4 = vcmask 64512  }
  0x65   : > { %v2132_v8 = vld [vmem:[%s2999_s26 + $0x10] sm:$0xff]  ;;  %v2138_v9 = vld [vmem:[%s429_s14] sm:$0xff]  ;;  %vm915_vm5 = vcmask 93184   ;;  %s3333_s6 = scalar_lea.vmem [#allocation9], %s1911_s24  ;;  %s3614_s3 = sld [smem:[#allocation17_spill]] }
  0x68   : > { %v2129_v0 = vld [vmem:[%s3612_s30] sm:$0xff] }
  0x69   : > { %596 = vmatpush.bf16.msra.mxu0 %v2129_v0  ;;  %2207 = vmatpush.bf16.msra.mxu1 %v2129_v0  ;;  %v3045_v13 = vld [vmem:[%s3613_s12] ss:$0 sm:$0xff] }
  0x6a   : > { %2208 = vmatpush.bf16.msra.mxu3 %v2129_v0  ;;  %1009 = vmatpush.bf16.msra.mxu2 %v2129_v0 }
  0x6b   : > { %p1969_p11 = scmp.ne.s32.totalorder %s3614_s3, 0 }
  0x6c   : > { %1951 = vmatmul.msk.bf16.vlgmr.msra.gmra.mxu0 %vm564_vm0, %v2130_v1  ;;  %1954 = vmatmul.msk.bf16.vlgmr.msra.gmra.mxu1 %vm564_vm0, %v2133_v2 }
  0x6d   : > { %949 = vmatpush.bf16.msrb.mxu1 %v2129_v0  ;;  %1956 = vmatmul.msk.bf16.vlgmr.msra.gmra.mxu3 %vm564_vm0, %v2135_v3 }
  0x6e   : > { %1968 = vmatmul.msk.bf16.vlgmr.msra.gmra.mxu2 %vm564_vm0, %v2139_v4 }
  0x7c   : > { %1952 = vmatmul.msk.bf16.gmra.mxu0 %vm564_vm0, %v2131_v5  ;;  %1955 = vmatmul.msk.bf16.gmra.mxu1 %vm564_vm0, %v2134_v6 }
  0x7d   : > { %1957 = vmatmul.msk.bf16.gmra.mxu3 %vm564_vm0, %v2136_v7 }
  0x8c   : > { %1953 = vmatmul.msk.bf16.gmra.mxu0 %vm564_vm0, %v2132_v8  ;;  %1963 = vmatmul.msk.bf16.vlgmr.msrb.gmra.mxu1 %vm564_vm0, %v2138_v9 }
  0x8d   : > { %1958 = vmatmul.msk.bf16.gmra.mxu3 %vm564_vm0, %v2137_v10 }
  0xe9   : > { %v598_v11 = vpop.f32.mrf.mxu0  ;;  %v613_v12 = vpop.f32.mrf.mxu1 }
  0xea   : > { %v614_v14 = vadd.f32 %v3045_v13, %v613_v12  ;;  %v599_v15 = vadd.f32 %v3045_v13, %v598_v11 }
  0xec   : > { %v3049_v16 = vmax.f32 %v614_v14, 0.0  ;;  %v3051_v20 = vmax.f32 %v599_v15, 0.0 }
  0xee   : > { %v680_v25 = vrot.slane %v3049_v16, 7  ;;  %v720_v30 = vrot.slane %v3051_v20, 1  ;;  %v671_v37 = vrot.slane %v3051_v20, 7  ;;  %v729_v48 = vrot.slane %v3049_v16, 1 }
  0xf0   : > { %v623_v17 = vpop.f32.mrf.mxu3 }
  0xf1   : > { %v600_v18 = vpop.f32.mrf.mxu0  ;;  %v615_v19 = vpop.f32.mrf.mxu1  ;;  %v624_v28 = vadd.f32 %v3045_v13, %v623_v17 }
  0xf2   : > { %v601_v21 = vadd.f32 %v3045_v13, %v600_v18  ;;  %v616_v22 = vadd.f32 %v3045_v13, %v615_v19  ;;  %v1011_v23 = vpop.f32.mrf.mxu2 }
  0xf3   : > { %v1012_v24 = vadd.f32 %v3045_v13, %v1011_v23  ;;  %v3071_v40 = vmax.f32 %v624_v28, 0.0 }
  0xf4   : > { %v639_v26 = vmax.f32 %v601_v21, 0.0  ;;  %v645_v27 = vmax.f32 %v616_v22, 0.0 }
  0xf5   : > { %v3058_v29 = vmax.f32 %v1012_v24, 0.0  ;;  %v735_v52 = vrot.slane %v3071_v40, 1  ;;  %v686_v56 = vrot.slane %v3071_v40, 7 }
  0xf6   : > { %v681_v31 = vrot.slane %v645_v27, 7  ;;  %v2357_v32 = vpack.i.bf16 %v645_v27, %v3049_v16  ;;  %v672_v33 = vrot.slane %v639_v26, 7  ;;  %v2352_v34 = vpack.i.bf16 %v639_v26, %v3051_v20 }
  0xf7   : > { %v721_v35 = vrot.slane %v639_v26, 1  ;;  %v1020_v36 = vrot.slane %v3058_v29, 7  ;;  %v730_v49 = vrot.slane %v645_v27, 1 }
  0xf8   : > { %v625_v38 = vpop.f32.mrf.mxu3  ;;  %2358 = vrot.lane.b32.xlu1 %v2357_v32, %s2703_s4  ;;  %v3069_v39 = vsel %vm670_vm1, %v680_v25, %v681_v31  ;;  %2353 = vrot.lane.b32.xlu0 %v2352_v34, %s2703_s4  ;;  %v3086_v51 = vsel %vm670_vm1, %v671_v37, %v672_v33 }
  0xf9   : > { %v626_v41 = vadd.f32 %v3045_v13, %v625_v38  ;;  %v603_v42 = vpop.f32.mrf.mxu0  ;;  %v618_v43 = vpop.f32.mrf.mxu1  ;;  %v722_v44 = vsel %vm719_vm2, %v720_v30, %v721_v35  ;;  %v752_v45 = vsel %vm719_vm2, %v721_v35, 0.0  ;;  %v3080_v47 = vsel %vm670_vm1, 0.0, %v1020_v36 }
  0xfa   : > { %v2362_v46 = vpack.i.bf16 %v752_v45, %v722_v44  ;;  %v619_v55 = vadd.f32 %v3045_v13, %v618_v43  ;;  %v731_v59 = vsel %vm719_vm2, %v729_v48, %v730_v49  ;;  %v755_v60 = vsel %vm719_vm2, %v730_v49, 0.0  ;;  %v1013_v7 = vpop.f32.mrf.mxu2 }
  0xfb   : > { %v649_v50 = vmax.f32 %v626_v41, 0.0  ;;  %v604_v61 = vadd.f32 %v3045_v13, %v603_v42  ;;  %v2367_v6 = vpack.i.bf16 %v755_v60, %v731_v59  ;;  %v1014_v17 = vadd.f32 %v3045_v13, %v1013_v7 }
  0xfc   : > { %2363 = vrot.lane.b32.xlu2 %v2362_v46, %s2704_s28  ;;  %v3097_v0 = vmax.f32 %v619_v55, 0.0 }
  0xfd   : > { %v687_v53 = vrot.slane %v649_v50, 7  ;;  %v736_v54 = vrot.slane %v649_v50, 1  ;;  %v3107_v8 = vmax.f32 %v604_v61, 0.0  ;;  %v2372_v30 = vpack.i.bf16 %v649_v50, %v3071_v40 }
  0xfe   : > { %v683_v12 = vrot.slane %v3097_v0, 7  ;;  %v3128_v31 = vmax.f32 %v1014_v17, 0.0 }
  0xff   : > { %v737_v57 = vsel %vm719_vm2, %v735_v52, %v736_v54  ;;  %v757_v58 = vsel %vm719_vm2, %v736_v54, 0.0  ;;  %v3102_v3 = vsel %vm670_vm1, %v686_v56, %v687_v53  ;;  %v674_v19 = vrot.slane %v3107_v8, 7 }
 0x100   : > { %v628_v62 = vpop.f32.mrf.mxu3  ;;  %v2382_v63 = vpack.i.bf16 %v757_v58, %v737_v57  ;;  %v723_v33 = vrot.slane %v3107_v8, 1  ;;  %v1021_v38 = vrot.slane %v3128_v31, 7  ;;  %v2377_v54 = vpack.i.bf16 %v3128_v31, %v3058_v29 }
 0x101   : > { %v605_v1 = vpop.f32.mrf.mxu0  ;;  %v620_v2 = vpop.f32.mrf.mxu1  ;;  %v629_v9 = vadd.f32 %v3045_v13, %v628_v62  ;;  %v732_v57 = vrot.slane %v3097_v0, 1 }
 0x102   : > { %v606_v4 = vadd.f32 %v3045_v13, %v605_v1  ;;  %2383 = vrot.lane.b32.xlu0 %v2382_v63, %s2704_s28  ;;  %v621_v5 = vadd.f32 %v3045_v13, %v620_v2  ;;  %v3157_v61 = vsel %vm670_vm1, %v1020_v36, %v1021_v38 }
 0x103   : > { %v3118_v21 = vmax.f32 %v629_v9, 0.0 }
 0x104   : > { %v641_v10 = vmax.f32 %v606_v4, 0.0  ;;  %v3110_v11 = vmax.f32 %v621_v5, 0.0  ;;  %2368 = vrot.lane.b32.xlu2 %v2367_v6, %s2704_s28 }
 0x105   : > { %v738_v35 = vrot.slane %v3118_v21, 1  ;;  %v689_v46 = vrot.slane %v3118_v21, 7 }
 0x106   : > { %v675_v14 = vrot.slane %v641_v10, 7  ;;  %v684_v15 = vrot.slane %v3110_v11, 7  ;;  %v2387_v18 = vpack.i.bf16 %v641_v10, %v3107_v8  ;;  %v724_v23 = vrot.slane %v641_v10, 1 }
 0x107   : > { %v733_v58 = vrot.slane %v3110_v11, 1 }
 0x108   : > { %v630_v22 = vpop.f32.mrf.mxu3  ;;  %v3124_v28 = vsel %vm670_vm1, %v683_v12, %v684_v15  ;;  %v3133_v32 = vsel %vm670_vm1, %v674_v19, %v675_v14  ;;  %v725_v43 = vsel %vm719_vm2, %v723_v33, %v724_v23  ;;  %v753_v44 = vsel %vm719_vm2, %v724_v23, 0.0 }
 0x109   : > { %v631_v24 = vadd.f32 %v3045_v13, %v630_v22  ;;  %v608_v26 = vpop.f32.mrf.mxu0  ;;  %v951_v27 = vpop.f32.mrf.mxu1  ;;  %v2397_v53 = vpack.i.bf16 %v753_v44, %v725_v43  ;;  %v734_v7 = vsel %vm719_vm2, %v732_v57, %v733_v58  ;;  %v756_v9 = vsel %vm719_vm2, %v733_v58, 0.0 }
 0x10a   : > { %2388 = vrot.lane.b32.xlu0 %v2387_v18, %s2703_s4  ;;  %v952_v45 = vadd.f32 %v3045_v13, %v951_v27  ;;  %v609_v48 = vadd.f32 %v3045_v13, %v608_v26  ;;  %v2402_v23 = vpack.i.bf16 %v756_v9, %v734_v7 }
 0x10b   : > { %v3136_v34 = vmax.f32 %v631_v24, 0.0 }
 0x10c   : > { %2373 = vrot.lane.b32.xlu2 %v2372_v30, %s2703_s4  ;;  %v3164_v63 = vmax.f32 %v952_v45, 0.0  ;;  %v3170_v4 = vmax.f32 %v609_v48, 0.0  ;;  %v2392_v30 = vpack.i.bf16 %v3110_v11, %v3097_v0 }
 0x10d   : > { %v690_v41 = vrot.slane %v3136_v34, 7  ;;  %v739_v42 = vrot.slane %v3136_v34, 1  ;;  %v2407_v48 = vpack.i.bf16 %v3136_v34, %v3118_v21 }
 0x10e   : > { %v960_v10 = vrot.slane %v3164_v63, 7  ;;  %v677_v17 = vrot.slane %v3170_v4, 7 }
 0x10f   : > { %v740_v49 = vsel %vm719_vm2, %v738_v35, %v739_v42  ;;  %v758_v50 = vsel %vm719_vm2, %v739_v42, 0.0  ;;  %v3162_v62 = vsel %vm670_vm1, %v689_v46, %v690_v41 }
 0x110   : > { %v2412_v52 = vpack.i.bf16 %v758_v50, %v740_v49  ;;  %v633_v55 = vpop.f32.mrf.mxu3  ;;  %v966_v50 = vrot.slane %v3164_v63, 1  ;;  %v713_v21 = vsel %vm670_vm1, 0.0, %v677_v17 }
 0x111   : > { %v610_v59 = vpop.f32.mrf.mxu0  ;;  %v953_v60 = vpop.f32.mrf.mxu1  ;;  %v634_v36 = vadd.f32 %v3045_v13, %v633_v55 }
 0x112   : > { %2413 = vrot.lane.b32.xlu1 %v2412_v52, %s2704_s28  ;;  %v611_v1 = vadd.f32 %v3045_v13, %v610_v59  ;;  %2398 = vrot.lane.b32.xlu0 %v2397_v53, %s2704_s28  ;;  %v954_v2 = vadd.f32 %v3045_v13, %v953_v60 }
 0x113   : > { %v3179_v22 = vmax.f32 %v634_v36, 0.0  ;;  %v1027_v36 = vrot.slane %v3128_v31, 1 }
 0x114   : > { %v643_v5 = vmax.f32 %v611_v1, 0.0  ;;  %v957_v6 = vmax.f32 %v954_v2, 0.0  ;;  %2378 = vrot.lane.b32.xlu2 %v2377_v54, %s2703_s4  ;;  %v726_v54 = vrot.slane %v3170_v4, 1  ;;  %v1026_v2 = vrot.slane %v3058_v29, 1 }
 0x115   : > { %v692_v35 = vrot.slane %v3179_v22, 7  ;;  %v714_v29 = vsel %vm670_vm1, 0.0, %v680_v25 }
 0x116   : > { %v678_v14 = vrot.slane %v643_v5, 7  ;;  %v961_v15 = vrot.slane %v957_v6, 7  ;;  %v2417_v18 = vpack.i.bf16 %v643_v5, %v3170_v4  ;;  %v2422_v45 = vpack.i.bf16 %v957_v6, %v3164_v63 }
 0x117   : > { %v727_v52 = vrot.slane %v643_v5, 1  ;;  %v967_v53 = vrot.slane %v957_v6, 1  ;;  %v1028_v5 = vsel %vm719_vm2, %v1026_v2, %v1027_v36  ;;  %v1030_v6 = vsel %vm719_vm2, %v1027_v36, 0.0 }
 0x118   : > { %v635_v24 = vpop.f32.mrf.mxu3  ;;  %v3185_v27 = vsel %vm670_vm1, %v677_v17, %v678_v14  ;;  %v3194_v33 = vsel %vm670_vm1, %v960_v10, %v961_v15  ;;  %v2447_v7 = vpack.i.bf16 %v1030_v6, %v1028_v5 }
 0x119   : > { %v636_v26 = vadd.f32 %v3045_v13, %v635_v24  ;;  %v741_v13 = vrot.slane %v3179_v22, 1  ;;  %v728_v55 = vsel %vm719_vm2, %v726_v54, %v727_v52  ;;  %v754_v57 = vsel %vm719_vm2, %v727_v52, 0.0 }
 0x11a   : > { %2418 = vrot.lane.b32.xlu1 %v2417_v18, %s2703_s4  ;;  %2403 = vrot.lane.b32.xlu0 %v2402_v23, %s2704_s28  ;;  %v968_v58 = vsel %vm719_vm2, %v966_v50, %v967_v53  ;;  %v970_v34 = vsel %vm719_vm2, %v967_v53, 0.0  ;;  %v2427_v59 = vpack.i.bf16 %v754_v57, %v728_v55  ;;  %v711_v18 = vsel %vm670_vm1, 0.0, %v671_v37 }
 0x11b   : > { %v653_v38 = vmax.f32 %v636_v26, 0.0  ;;  %v2442_v60 = vpack.i.bf16 %v970_v34, %v968_v58 }
 0x11c   : > { %2393 = vrot.lane.b32.xlu2 %v2392_v30, %s2703_s4 }
 0x11d   : > { %v693_v41 = vrot.slane %v653_v38, 7  ;;  %v742_v42 = vrot.slane %v653_v38, 1  ;;  %v2432_v1 = vpack.i.bf16 %v653_v38, %v3179_v22 }
 0x11f   : > { %v743_v43 = vsel %vm719_vm2, %v741_v13, %v742_v42  ;;  %v759_v44 = vsel %vm719_vm2, %v742_v42, 0.0  ;;  %v3204_v11 = vsel %vm670_vm1, %v692_v35, %v693_v41 }
 0x120   : > { %v2437_v49 = vpack.i.bf16 %v759_v44, %v743_v43 }
 0x122   : > { %2423 = vrot.lane.b32.xlu1 %v2422_v45, %s2703_s4  ;;  %2408 = vrot.lane.b32.xlu0 %v2407_v48, %s2703_s4 }
 0x124   : > { %2438 = vrot.lane.b32.xlu2 %v2437_v49, %s2704_s28 }
 0x12a   : > { %2428 = vrot.lane.b32.xlu1 %v2427_v59, %s2704_s28  ;;  %2443 = vrot.lane.b32.xlu0 %v2442_v60, %s2704_s28 }
 0x132   : > { %2433 = vrot.lane.b32.xlu1 %v2432_v1, %s2703_s4  ;;  %v716_v1 = vsel %vm670_vm1, 0.0, %v686_v56 }
 0x13a   : > { %2448 = vrot.lane.b32.xlu1 %v2447_v7, %s2704_s28 }
 0x156   : > { %v2364_v9 = vpop.permute.xlu2 %2363 }
 0x157   : > { %v2366_v42 = vunpack.i.h.bf16 %v2364_v9  ;;  %v2365_v43 = vunpack.i.l.bf16 %v2364_v9 }
 0x15e   : > { %v2369_v14 = vpop.permute.xlu2 %2368 }
 0x15f   : > { %v2371_v30 = vunpack.i.h.bf16 %v2369_v14  ;;  %v2370_v13 = vunpack.i.l.bf16 %v2369_v14 }
 0x166   : > { %v2374_v15 = vpop.permute.xlu2 %2373 }
 0x167   : > { %v2376_v58 = vunpack.i.h.bf16 %v2374_v15  ;;  %v2375_v34 = vunpack.i.l.bf16 %v2374_v15 }
 0x169   : > { %v876_v5 = vsel %vm864_vm3, %v3102_v3, %v2376_v58  ;;  %v712_v3 = vsel %vm670_vm1, 0.0, %v674_v19 }
 0x16a   : > { %v2359_v31 = vpop.permute.xlu1 %2358  ;;  %v2354_v26 = vpop.permute.xlu0 %2353 }
 0x16b   : > { %v2361_v23 = vunpack.i.h.bf16 %v2359_v31  ;;  %v2360_v24 = vunpack.i.l.bf16 %v2359_v31  ;;  %v2356_v38 = vunpack.i.h.bf16 %v2354_v26  ;;  %v2355_v41 = vunpack.i.l.bf16 %v2354_v26 }
 0x16d   : > { %v871_v20 = vsel %vm864_vm3, %v714_v29, %v2360_v24  ;;  %v872_v16 = vsel %vm864_vm3, %v3069_v39, %v2361_v23  ;;  %v865_v44 = vsel %vm864_vm3, %v711_v18, %v2355_v41  ;;  %v866_v45 = vsel %vm864_vm3, %v3086_v51, %v2356_v38 }
 0x16e   : > { %v888_v25 = vsel %vm881_vm4, %v871_v20, %v2370_v13  ;;  %v889_v37 = vsel %vm881_vm4, %v872_v16, %v2371_v30  ;;  %v2379_v48 = vpop.permute.xlu2 %2378  ;;  %v882_v52 = vsel %vm881_vm4, %v865_v44, %v2365_v43  ;;  %v883_v53 = vsel %vm881_vm4, %v866_v45, %v2366_v42 }
 0x16f   : > { %v904_v49 = vpack.c.bf16 %v888_v25, %v888_v25  ;;  %v905_v50 = vpack.c.bf16 %v889_v37, %v889_v37  ;;  %v898_v54 = vpack.c.bf16 %v882_v52, %v882_v52  ;;  %v899_v55 = vpack.c.bf16 %v883_v53, %v883_v53 }
 0x170   : > { %v2381_v57 = vunpack.i.h.bf16 %v2379_v48  ;;  %v2380_v39 = vunpack.i.l.bf16 %v2379_v48 }
 0x171   : > { %922 = vst.msk [vmem:[#allocation2 + $0x20] sm:$0xf] %vm915_vm5, %v904_v49 }
 0x172   : > { %923 = vst.msk [vmem:[#allocation2 + $0x24] sm:$0xf] %vm915_vm5, %v905_v50  ;;  %v3247_v51 = vsel %vm864_vm3, %v3157_v61, %v2381_v57  ;;  %v3251_v59 = vsel %vm864_vm3, %v3080_v47, %v2380_v39  ;;  %v875_v61 = vsel %vm864_vm3, %v716_v1, %v2375_v34 }
 0x173   : > { %916 = vst.msk [vmem:[#allocation2 + $0x8] sm:$0xf] %vm915_vm5, %v898_v54 }
 0x174   : > { %917 = vst.msk [vmem:[#allocation2 + $0xc] sm:$0xf] %vm915_vm5, %v899_v55  ;;  %v2384_v60 = vpop.permute.xlu0 %2383 }
 0x175   : > { %v2386_v2 = vunpack.i.h.bf16 %v2384_v60  ;;  %v2385_v36 = vunpack.i.l.bf16 %v2384_v60 }
 0x176   : > { %v2394_v26 = vpop.permute.xlu2 %2393 }
 0x177   : > { %v892_v6 = vsel %vm881_vm4, %v875_v61, %v2385_v36  ;;  %v893_v47 = vsel %vm881_vm4, %v876_v5, %v2386_v2  ;;  %v2396_v42 = vunpack.i.h.bf16 %v2394_v26  ;;  %v2395_v43 = vunpack.i.l.bf16 %v2394_v26 }
 0x178   : > { %v908_v7 = vpack.c.bf16 %v892_v6, %v892_v6  ;;  %v909_v9 = vpack.c.bf16 %v893_v47, %v893_v47  ;;  %v718_v26 = vsel %vm670_vm1, 0.0, %v692_v35 }
 0x179   : > { %v874_v25 = vsel %vm864_vm3, %v3124_v28, %v2396_v42  ;;  %v717_v28 = vsel %vm670_vm1, 0.0, %v689_v46  ;;  %v965_v46 = vsel %vm670_vm1, 0.0, %v960_v10 }
 0x17a   : > { %926 = vst.msk [vmem:[#allocation2 + $0x30] sm:$0xf] %vm915_vm5, %v908_v7 }
 0x17b   : > { %927 = vst.msk [vmem:[#allocation2 + $0x34] sm:$0xf] %vm915_vm5, %v909_v9 }
 0x17c   : > { %v2389_v40 = vpop.permute.xlu0 %2388 }
 0x17d   : > { %v2391_v14 = vunpack.i.h.bf16 %v2389_v40  ;;  %v2390_v56 = vunpack.i.l.bf16 %v2389_v40 }
 0x17f   : > { %v868_v23 = vsel %vm864_vm3, %v3133_v32, %v2391_v14  ;;  %v867_v24 = vsel %vm864_vm3, %v712_v3, %v2390_v56  ;;  %v715_v32 = vsel %vm670_vm1, 0.0, %v683_v12 }
 0x180   : > { %v873_v37 = vsel %vm864_vm3, %v715_v32, %v2395_v43 }
 0x184   : > { %v2414_v15 = vpop.permute.xlu1 %2413  ;;  %v2399_v18 = vpop.permute.xlu0 %2398 }
 0x185   : > { %v2401_v29 = vunpack.i.h.bf16 %v2399_v18  ;;  %v2400_v31 = vunpack.i.l.bf16 %v2399_v18  ;;  %v2416_v53 = vunpack.i.h.bf16 %v2414_v15  ;;  %v2415_v54 = vunpack.i.l.bf16 %v2414_v15 }
 0x187   : > { %v884_v30 = vsel %vm881_vm4, %v867_v24, %v2400_v31  ;;  %v885_v13 = vsel %vm881_vm4, %v868_v23, %v2401_v29 }
 0x188   : > { %v900_v38 = vpack.c.bf16 %v884_v30, %v884_v30  ;;  %v901_v41 = vpack.c.bf16 %v885_v13, %v885_v13 }
 0x18a   : > { %918 = vst.msk [vmem:[#allocation2 + $0x10] sm:$0xf] %vm915_vm5, %v900_v38 }
 0x18b   : > { %919 = vst.msk [vmem:[#allocation2 + $0x14] sm:$0xf] %vm915_vm5, %v901_v41 }
 0x18c   : > { %v2419_v8 = vpop.permute.xlu1 %2418  ;;  %v2404_v19 = vpop.permute.xlu0 %2403 }
 0x18d   : > { %v2406_v20 = vunpack.i.h.bf16 %v2404_v19  ;;  %v2405_v16 = vunpack.i.l.bf16 %v2404_v19  ;;  %v2421_v1 = vunpack.i.h.bf16 %v2419_v8  ;;  %v2420_v2 = vunpack.i.l.bf16 %v2419_v8 }
 0x18f   : > { %v890_v44 = vsel %vm881_vm4, %v873_v37, %v2405_v16  ;;  %v891_v45 = vsel %vm881_vm4, %v874_v25, %v2406_v20  ;;  %v869_v40 = vsel %vm864_vm3, %v713_v21, %v2420_v2  ;;  %v870_v14 = vsel %vm864_vm3, %v3185_v27, %v2421_v1  ;;  %v2439_v27 = vpop.permute.xlu2 %2438 }
 0x190   : > { %v906_v48 = vpack.c.bf16 %v890_v44, %v890_v44  ;;  %v907_v49 = vpack.c.bf16 %v891_v45, %v891_v45  ;;  %v2441_v30 = vunpack.i.h.bf16 %v2439_v27  ;;  %v2440_v13 = vunpack.i.l.bf16 %v2439_v27 }
 0x192   : > { %924 = vst.msk [vmem:[#allocation2 + $0x28] sm:$0xf] %vm915_vm5, %v906_v48 }
 0x193   : > { %925 = vst.msk [vmem:[#allocation2 + $0x2c] sm:$0xf] %vm915_vm5, %v907_v49 }
 0x194   : > { %v2424_v0 = vpop.permute.xlu1 %2423  ;;  %v2409_v50 = vpop.permute.xlu0 %2408 }
 0x195   : > { %v2411_v12 = vunpack.i.h.bf16 %v2409_v50  ;;  %v2410_v52 = vunpack.i.l.bf16 %v2409_v50  ;;  %v2426_v36 = vunpack.i.h.bf16 %v2424_v0  ;;  %v2425_v5 = vunpack.i.l.bf16 %v2424_v0 }
 0x197   : > { %v878_v55 = vsel %vm864_vm3, %v3162_v62, %v2411_v12  ;;  %v877_v57 = vsel %vm864_vm3, %v717_v28, %v2410_v52  ;;  %v985_v4 = vsel %vm864_vm3, %v3194_v33, %v2426_v36  ;;  %v984_v63 = vsel %vm864_vm3, %v965_v46, %v2425_v5 }
 0x198   : > { %v895_v39 = vsel %vm881_vm4, %v878_v55, %v2416_v53  ;;  %v894_v58 = vsel %vm881_vm4, %v877_v57, %v2415_v54 }
 0x199   : > { %v911_v34 = vpack.c.bf16 %v895_v39, %v895_v39  ;;  %v910_v60 = vpack.c.bf16 %v894_v58, %v894_v58 }
 0x19b   : > { %929 = vst.msk [vmem:[#allocation2 + $0x3c] sm:$0xf] %vm915_vm5, %v911_v34 }
 0x19c   : > { %928 = vst.msk [vmem:[#allocation2 + $0x38] sm:$0xf] %vm915_vm5, %v910_v60  ;;  %v2429_v62 = vpop.permute.xlu1 %2428  ;;  %v2444_v61 = vpop.permute.xlu0 %2443 }
 0x19d   : > { %v2431_v6 = vunpack.i.h.bf16 %v2429_v62  ;;  %v2430_v47 = vunpack.i.l.bf16 %v2429_v62  ;;  %v2446_v7 = vunpack.i.h.bf16 %v2444_v61  ;;  %v2445_v9 = vunpack.i.l.bf16 %v2444_v61 }
 0x19f   : > { %v886_v10 = vsel %vm881_vm4, %v869_v40, %v2430_v47  ;;  %v887_v17 = vsel %vm881_vm4, %v870_v14, %v2431_v6  ;;  %v987_v56 = vsel %vm881_vm4, %v985_v4, %v2446_v7  ;;  %v986_v15 = vsel %vm881_vm4, %v984_v63, %v2445_v9 }
 0x1a0   : > { %v902_v18 = vpack.c.bf16 %v886_v10, %v886_v10  ;;  %v903_v3 = vpack.c.bf16 %v887_v17, %v887_v17  ;;  %v989_v29 = vpack.c.bf16 %v987_v56, %v987_v56  ;;  %v988_v31 = vpack.c.bf16 %v986_v15, %v986_v15 }
 0x1a2   : > { %920 = vst.msk [vmem:[#allocation2 + $0x18] sm:$0xf] %vm915_vm5, %v902_v18 }
 0x1a3   : > { %921 = vst.msk [vmem:[#allocation2 + $0x1c] sm:$0xf] %vm915_vm5, %v903_v3 }
 0x1a4   : > { %991 = vst.msk [vmem:[#allocation2 + $0x4] sm:$0xf] %vm915_vm5, %v989_v29  ;;  %v2434_v33 = vpop.permute.xlu1 %2433 }
 0x1a5   : > { %990 = vst.msk [vmem:[#allocation2] sm:$0xf] %vm915_vm5, %v988_v31  ;;  %v2436_v23 = vunpack.i.h.bf16 %v2434_v33  ;;  %v2435_v24 = vunpack.i.l.bf16 %v2434_v33 }
 0x1a7   : > { %v880_v38 = vsel %vm864_vm3, %v3204_v11, %v2436_v23  ;;  %v879_v41 = vsel %vm864_vm3, %v718_v26, %v2435_v24 }
 0x1a8   : > { %v896_v42 = vsel %vm881_vm4, %v879_v41, %v2440_v13  ;;  %v897_v43 = vsel %vm881_vm4, %v880_v38, %v2441_v30 }
 0x1a9   : > { %v912_v8 = vpack.c.bf16 %v896_v42, %v896_v42  ;;  %v913_v19 = vpack.c.bf16 %v897_v43, %v897_v43 }
 0x1ab   : > { %930 = vst.msk [vmem:[#allocation2 + $0x40] sm:$0xf] %vm915_vm5, %v912_v8 }
 0x1ac   : > { %931 = vst.msk [vmem:[#allocation2 + $0x44] sm:$0xf] %vm915_vm5, %v913_v19  ;;  %v2449_v22 = vpop.permute.xlu1 %2448 }
 0x1ad   : > { %v2451_v35 = vunpack.i.h.bf16 %v2449_v22  ;;  %v2450_v32 = vunpack.i.l.bf16 %v2449_v22 }
 0x1af   : > { %v1046_v20 = vsel %vm881_vm4, %v3251_v59, %v2450_v32  ;;  %v1047_v11 = vsel %vm881_vm4, %v3247_v51, %v2451_v35  ;;  %1056 = sbr.rel (%p1969_p11) target bundleno = 439 (0x1b7), region = 72 }
 0x1b0   : > { %v1048_v16 = vpack.c.bf16 %v1046_v20, %v1046_v20  ;;  %v1049_v25 = vpack.c.bf16 %v1047_v11, %v1047_v11 }
 0x1b2   : > { %1051 = vst.msk [vmem:[#allocation2 + $0x48] sm:$0xf] %vm915_vm5, %v1048_v16 }
 0x1b3   : > { %1052 = vst.msk [vmem:[#allocation2 + $0x4c] sm:$0xf] %vm915_vm5, %v1049_v25 }
 0x1b4   : > { %v2705_v37 = vmov 0  }
 0x1b5   : > { %1057 = vst.msk [vmem:[#allocation2] sm:$0xf] %vm915_vm5, %v2705_v37 }
 0x1b6   : > { %1058 = vst.msk [vmem:[#allocation2 + $0x4] sm:$0xf] %vm915_vm5, %v2705_v37 }
 0x1b7 PF: > { %s3615_s1 = sld [smem:[#allocation17_spill]] }
 0x1bd   : > { %p1970_p0 = scmp.ne.s32.totalorder %s3615_s1, 1 }
 0x1bf   : > { %1062 = sbr.rel (%p1970_p0) target bundleno = 455 (0x1c7), region = 76 }
 0x1c4   : > { %v2706_v51 = vmov 0  }
 0x1c5   : > { %1063 = vst.msk [vmem:[#allocation2 + $0x48] sm:$0xf] %vm915_vm5, %v2706_v51 }
 0x1c6   : > { %1064 = vst.msk [vmem:[#allocation2 + $0x4c] sm:$0xf] %vm915_vm5, %v2706_v51 }
 0x1c7 PF: > { %s3616_s15 = sld [smem:[#allocation31_spill]]  ;;  %vm1172_vm6 = vcmask 1045504   ;;  %v2149_v53 = vld [vmem:[#allocation2 + $0x8] sm:$0xff]  ;;  %vm1147_vm7 = vcmask 97280   ;;  %v2140_v55 = vld [vmem:[#allocation2] sm:$0xff]  ;;  %v2158_v39 = vld [vmem:[#allocation2 + $0x10] sm:$0xff] }
 0x1c8   : > { %v2150_v58 = vld [vmem:[#allocation2 + $0x10] sm:$0xff]  ;;  %v2141_v34 = vld [vmem:[#allocation2 + $0x8] sm:$0xff]  ;;  %v2159_v60 = vld [vmem:[#allocation2 + $0x18] sm:$0xff]  ;;  %s3618_s28 = sld [smem:[#allocation33_spill]]  ;;  %vm1576_vm8 = vcmask 1041408   ;;  %vm1709_vm9 = vcmask 125952  }
 0x1c9   : > { %v2151_v1 = vld [vmem:[#allocation2 + $0x18] sm:$0xff]  ;;  %v2142_v2 = vld [vmem:[#allocation2 + $0x10] sm:$0xff]  ;;  %v2160_v36 = vld [vmem:[#allocation2 + $0x20] sm:$0xff]  ;;  %s3619_s24 = sld [smem:[#allocation32_spill]]  ;;  %s1742_s12 = sshll.u32 %s3333_s6, 4  ;;  %s1743_s12 = int_to_ptr.vmem [resolvable:$true] %s1742_s12 }
 0x1ca   : > { %v2152_v5 = vld [vmem:[#allocation2 + $0x20] sm:$0xff]  ;;  %v2143_v21 = vld [vmem:[#allocation2 + $0x18] sm:$0xff]  ;;  %v2161_v46 = vld [vmem:[#allocation2 + $0x28] sm:$0xff]  ;;  %s3620_s20 = sld [smem:[#allocation34_spill]]  ;;  %s1727_s3 = scalar_lea.sflag [#allocation5], %s2993_s25 }
 0x1cb   : > { %v2153_v62 = vld [vmem:[#allocation2 + $0x28] sm:$0xff]  ;;  %v2144_v61 = vld [vmem:[#allocation2 + $0x20] sm:$0xff]  ;;  %v2162_v6 = vld [vmem:[#allocation2 + $0x30] sm:$0xff]  ;;  %s3621_s21 = sld [smem:[#allocation17_spill]] }
 0x1cc   : > { %v2154_v47 = vld [vmem:[#allocation2 + $0x30] sm:$0xff]  ;;  %v2145_v7 = vld [vmem:[#allocation2 + $0x28] sm:$0xff]  ;;  %v2163_v9 = vld [vmem:[#allocation2 + $0x38] sm:$0xff]  ;;  %s3622_s14 = sld [smem:[#allocation18_spill]] }
 0x1cd   : > { %s3617_s5 = smov %s3616_s15  ;;  %v2007_v59 = vld [vmem:[%s3616_s15 + $0x8] sm:$0xf]  ;;  %v2155_v40 = vld [vmem:[#allocation2 + $0x38] sm:$0xff]  ;;  %v2146_v14 = vld [vmem:[#allocation2 + $0x30] sm:$0xff]  ;;  %s3623_s30 = sld [smem:[#allocation35_spill]] }
 0x1ce   : > { %v2157_v44 = vld [vmem:[%s3617_s5 + $0x8] sm:$0x30]  ;;  %v2051_v48 = vld [vmem:[%s3617_s5] sm:$0xf]  ;;  %v2148_v49 = vld [vmem:[%s3617_s5] sm:$0x30] }
 0x1cf   : > { %v2008_v45 = vor.u32 %v2157_v44, %v2007_v59  ;;  %v2097_v0 = vld [vmem:[%s3617_s5 + $0x10] sm:$0xf]  ;;  %v2052_v50 = vor.u32 %v2148_v49, %v2051_v48  ;;  %v2166_v12 = vld [vmem:[%s3617_s5 + $0x10] sm:$0x30]  ;;  %v2164_v4 = vld [vmem:[#allocation2 + $0x40] sm:$0xff] }
 0x1d0   : > { %v2098_v28 = vor.u32 %v2166_v12, %v2097_v0  ;;  %v2156_v63 = vld [vmem:[#allocation2 + $0x40] sm:$0xff]  ;;  %v2147_v10 = vld [vmem:[#allocation2 + $0x38] sm:$0xff]  ;;  %v2165_v17 = vld [vmem:[#allocation2 + $0x48] sm:$0xff] }
 0x1d1   : > { %v1174_v52 = vsel %vm1172_vm6, %v2008_v45, 0  ;;  %v1295_v54 = vsel %vm1172_vm6, %v2052_v50, 0  ;;  %v1547_v56 = vld [vmem:[%s3618_s28] sm:$0x3]  ;;  %s2167_s19 = sshll.u32 %s3621_s21, 4 }
 0x1d2   : > { %1183 = vmatpush.bf16.msrb.mxu3 %v1174_v52  ;;  %1304 = vmatpush.bf16.msra.mxu1 %v1295_v54  ;;  %v1436_v57 = vsel %vm1172_vm6, %v2098_v28, 0  ;;  %v1578_v15 = vsel %vm1576_vm8, %v1547_v56, 0  ;;  %v3389_v23 = vld [vmem:[%s3619_s24] ss:$0 sm:$0xff]  ;;  %s2118_s7 = sshll.u32 %s3622_s14, 5 }
 0x1d3   : > { %1445 = vmatpush.bf16.msrb.mxu2 %v1436_v57  ;;  %1587 = vmatpush.bf16.msrb.mxu0 %v1578_v15  ;;  %s1739_s18 = sadd.s32 %s2167_s19, %s2118_s7  ;;  %s3624_s9 = smov %s3623_s30 }
 0x1d4   : > { %s2119_s23 = sshll.u32 %s1739_s18, 2 }
 0x1d5   : > { %2009 = vmatmul.msk.bf16.vlgmr.msrb.gmra.mxu3 %vm1147_vm7, %v2149_v53  ;;  %2053 = vmatmul.msk.bf16.vlgmr.msra.gmra.mxu1 %vm1147_vm7, %v2140_v55  ;;  %s1741_s17 = scalar_lea.hbm %s3623_s30, %s2119_s23 }
 0x1d6   : > { %2099 = vmatmul.msk.bf16.vlgmr.msrb.gmra.mxu2 %vm1147_vm7, %v2158_v39  ;;  %s1744_s28 = sshll.u32 %s1741_s17, 4  ;;  %s1745_s28 = int_to_ptr.hbm [resolvable:$true] %s1744_s28 }
 0x1d7   : > { %s2559_s1 = sshra.s32 %s1745_s28, 4  ;;  %s2560_s1 = int_to_ptr.hbm [resolvable:$true] %s2559_s1 }
 0x1d8   : > { %s2561_s24 = scalar_lea.hbm %s2560_s1, 64  ;;  %p2566_p8 = scmp.lt.s32.totalorder %s2560_s1, %s3624_s9 }
 0x1d9   : > { %p2562_p7 = scmp.ne.s32.totalorder %s2560_s1, %s2561_s24 }
 0x1db   : > { %p2563_p3 = pnand %p2562_p7, %p2929_p4 }
 0x1dd   : > { %p2564_p5 = pneg %p2563_p3 }
 0x1e5   : > { %2010 = vmatmul.msk.bf16.gmra.mxu3 %vm1147_vm7, %v2150_v58  ;;  %2054 = vmatmul.msk.bf16.gmra.mxu1 %vm1147_vm7, %v2141_v34 }
 0x1e6   : > { %2100 = vmatmul.msk.bf16.gmra.mxu2 %vm1147_vm7, %v2159_v60 }
 0x1f5   : > { %2011 = vmatmul.msk.bf16.gmra.mxu3 %vm1147_vm7, %v2151_v1  ;;  %2055 = vmatmul.msk.bf16.gmra.mxu1 %vm1147_vm7, %v2142_v2 }
 0x1f6   : > { %2101 = vmatmul.msk.bf16.gmra.mxu2 %vm1147_vm7, %v2160_v36 }
 0x205   : > { %2012 = vmatmul.msk.bf16.gmra.mxu3 %vm1147_vm7, %v2152_v5  ;;  %2056 = vmatmul.msk.bf16.gmra.mxu1 %vm1147_vm7, %v2143_v21 }
 0x206   : > { %2102 = vmatmul.msk.bf16.gmra.mxu2 %vm1147_vm7, %v2161_v46 }
 0x215   : > { %2013 = vmatmul.msk.bf16.gmra.mxu3 %vm1147_vm7, %v2153_v62  ;;  %2057 = vmatmul.msk.bf16.gmra.mxu1 %vm1147_vm7, %v2144_v61 }
 0x216   : > { %2103 = vmatmul.msk.bf16.gmra.mxu2 %vm1147_vm7, %v2162_v6 }
 0x225   : > { %2014 = vmatmul.msk.bf16.gmra.mxu3 %vm1147_vm7, %v2154_v47  ;;  %2058 = vmatmul.msk.bf16.gmra.mxu1 %vm1147_vm7, %v2145_v7 }
 0x226   : > { %2104 = vmatmul.msk.bf16.gmra.mxu2 %vm1147_vm7, %v2163_v9 }
 0x235   : > { %2015 = vmatmul.msk.bf16.gmra.mxu3 %vm1147_vm7, %v2155_v40  ;;  %2059 = vmatmul.msk.bf16.gmra.mxu1 %vm1147_vm7, %v2146_v14 }
 0x236   : > { %2105 = vmatmul.msk.bf16.gmra.mxu2 %vm1147_vm7, %v2164_v4 }
 0x245   : > { %2016 = vmatmul.msk.bf16.gmra.mxu3 %vm1147_vm7, %v2156_v63  ;;  %2060 = vmatmul.msk.bf16.gmra.mxu1 %vm1147_vm7, %v2147_v10 }
 0x246   : > { %2106 = vmatmul.msk.bf16.gmra.mxu2 %vm1147_vm7, %v2165_v17 }
 0x252   : > { %v1306_v18 = vpop.f32.mrf.mxu1 }
 0x258   : > { %v1185_v3 = vpop.f32.mrf.mxu3 }
 0x259   : > { %v1447_v29 = vpop.f32.mrf.mxu2  ;;  %v1307_v31 = vadd.f32 %v1306_v18, %v1185_v3 }
 0x25a   : > { %v1308_v27 = vpop.f32.mrf.mxu1 }
 0x25b   : > { %v1487_v33 = vadd.f32 %v1447_v29, %v1307_v31 }
 0x25d   : > { %v1507_v13 = vadd.f32 %v3389_v23, %v1487_v33 }
 0x25f   : > { %v1523_v43 = vmax.f32 %v1507_v13, 0.0 }
 0x260   : > { %v1187_v24 = vpop.f32.mrf.mxu3 }
 0x261   : > { %v1309_v26 = vadd.f32 %v1308_v27, %v1187_v24  ;;  %v1449_v30 = vpop.f32.mrf.mxu2 }
 0x262   : > { %v1311_v41 = vpop.f32.mrf.mxu1 }
 0x263   : > { %v1488_v38 = vadd.f32 %v1449_v30, %v1309_v26 }
 0x265   : > { %v1508_v42 = vadd.f32 %v3389_v23, %v1488_v38 }
 0x267   : > { %v1524_v8 = vmax.f32 %v1508_v42, 0.0 }
 0x268   : > { %v1190_v19 = vpop.f32.mrf.mxu3 }
 0x269   : > { %v1539_v22 = vpack.c.bf16 %v1524_v8, %v1523_v43  ;;  %v1452_v35 = vpop.f32.mrf.mxu2  ;;  %v1312_v32 = vadd.f32 %v1311_v41, %v1190_v19 }
 0x26a   : > { %v1313_v20 = vpop.f32.mrf.mxu1 }
 0x26b   : > { %2107 = vmatmul.msk.bf16.vlgmr.msrb.gmra.mxu0 %vm864_vm3, %v1539_v22  ;;  %v1489_v11 = vadd.f32 %v1452_v35, %v1312_v32 }
 0x26d   : > { %v1509_v51 = vadd.f32 %v3389_v23, %v1489_v11 }
 0x26f   : > { %v1525_v48 = vmax.f32 %v1509_v51, 0.0 }
 0x270   : > { %v1192_v16 = vpop.f32.mrf.mxu3 }
 0x271   : > { %v1314_v25 = vadd.f32 %v1313_v20, %v1192_v16  ;;  %v1454_v37 = vpop.f32.mrf.mxu2 }
 0x272   : > { %v1316_v44 = vpop.f32.mrf.mxu1 }
 0x273   : > { %v1490_v59 = vadd.f32 %v1454_v37, %v1314_v25 }
 0x275   : > { %v1510_v45 = vadd.f32 %v3389_v23, %v1490_v59 }
 0x277   : > { %v1526_v49 = vmax.f32 %v1510_v45, 0.0 }
 0x278   : > { %v1195_v0 = vpop.f32.mrf.mxu3 }
 0x279   : > { %v1540_v50 = vpack.c.bf16 %v1526_v49, %v1525_v48  ;;  %v1457_v12 = vpop.f32.mrf.mxu2  ;;  %v1317_v52 = vadd.f32 %v1316_v44, %v1195_v0 }
 0x27a   : > { %v1318_v28 = vpop.f32.mrf.mxu1 }
 0x27b   : > { %2108 = vmatmul.msk.bf16.gmra.mxu0 %vm864_vm3, %v1540_v50  ;;  %v1491_v53 = vadd.f32 %v1457_v12, %v1317_v52 }
 0x27d   : > { %v1511_v39 = vadd.f32 %v3389_v23, %v1491_v53 }
 0x27f   : > { %v1527_v1 = vmax.f32 %v1511_v39, 0.0 }
 0x280   : > { %v1197_v54 = vpop.f32.mrf.mxu3 }
 0x281   : > { %v1319_v55 = vadd.f32 %v1318_v28, %v1197_v54  ;;  %v1459_v57 = vpop.f32.mrf.mxu2 }
 0x282   : > { %v1321_v34 = vpop.f32.mrf.mxu1 }
 0x283   : > { %v1492_v58 = vadd.f32 %v1459_v57, %v1319_v55 }
 0x285   : > { %v1512_v60 = vadd.f32 %v3389_v23, %v1492_v58 }
 0x287   : > { %v1528_v2 = vmax.f32 %v1512_v60, 0.0 }
 0x288   : > { %v1200_v36 = vpop.f32.mrf.mxu3 }
 0x289   : > { %v1541_v5 = vpack.c.bf16 %v1528_v2, %v1527_v1  ;;  %v1462_v21 = vpop.f32.mrf.mxu2  ;;  %v1322_v46 = vadd.f32 %v1321_v34, %v1200_v36 }
 0x28a   : > { %v1323_v62 = vpop.f32.mrf.mxu1 }
 0x28b   : > { %2109 = vmatmul.msk.bf16.gmra.mxu0 %vm864_vm3, %v1541_v5  ;;  %v1493_v61 = vadd.f32 %v1462_v21, %v1322_v46 }
 0x28d   : > { %v1513_v9 = vadd.f32 %v3389_v23, %v1493_v61 }
 0x28f   : > { %v1529_v63 = vmax.f32 %v1513_v9, 0.0 }
 0x290   : > { %v1202_v6 = vpop.f32.mrf.mxu3 }
 0x291   : > { %v1324_v47 = vadd.f32 %v1323_v62, %v1202_v6  ;;  %v1464_v7 = vpop.f32.mrf.mxu2 }
 0x292   : > { %v1326_v14 = vpop.f32.mrf.mxu1 }
 0x293   : > { %v1494_v40 = vadd.f32 %v1464_v7, %v1324_v47 }
 0x295   : > { %v1514_v4 = vadd.f32 %v3389_v23, %v1494_v40 }
 0x297   : > { %v1530_v10 = vmax.f32 %v1514_v4, 0.0  ;;  %v2169_v4 = vld [vmem:[%s2999_s26] sm:$0xff]  }
 0x298   : > { %v1205_v17 = vpop.f32.mrf.mxu3 }
 0x299   : > { %v1542_v56 = vpack.c.bf16 %v1530_v10, %v1529_v63  ;;  %v1467_v15 = vpop.f32.mrf.mxu2  ;;  %v1327_v18 = vadd.f32 %v1326_v14, %v1205_v17  ;;  %v3419_v63 = vld [vmem:[%s3620_s20] ss:$0 sm:$0xff]  ;;  %v2170_v10 = vunpack.c.l.bf16 %v2169_v4  ;;  %s2565_s20 = scalar_lea.hbm %s3624_s9, 256 }
 0x29a   : > { %v1328_v3 = vpop.f32.mrf.mxu1  ;;  %p2567_p9 = scmp.lt.s32.totalorder %s2565_s20, %s2561_s24 }
 0x29b   : > { %2110 = vmatmul.msk.bf16.gmra.mxu0 %vm864_vm3, %v1542_v56  ;;  %v1495_v29 = vadd.f32 %v1467_v15, %v1327_v18 }
 0x29c   : > { %p2568_p10 = por %p2567_p9, %p2566_p8 }
 0x29d   : > { %v1515_v24 = vadd.f32 %v3389_v23, %v1495_v29 }
 0x29e   : > { %p2569_p12 = pnand %p2568_p10, %p2564_p5 }
 0x29f   : > { %v1531_v38 = vmax.f32 %v1515_v24, 0.0 }
 0x2a0   : > { %v1207_v31 = vpop.f32.mrf.mxu3 }
 0x2a1   : > { %v1329_v27 = vadd.f32 %v1328_v3, %v1207_v31  ;;  %v1469_v33 = vpop.f32.mrf.mxu2  ;;  %v2171_v3 = vunpack.c.h.bf16 %v2169_v4  ;;  %v2204_v4 = vld [vmem:[%s2999_s26 + $0x28] sm:$0xff]  }
 0x2a2   : > { %v1331_v30 = vpop.f32.mrf.mxu1 }
 0x2a3   : > { %v1496_v26 = vadd.f32 %v1469_v33, %v1329_v27  ;;  %v2200_v33 = vld [vmem:[%s2999_s26 + $0x8] sm:$0xff]  }
 0x2a5   : > { %v1516_v13 = vadd.f32 %v3389_v23, %v1496_v26 }
 0x2a7   : > { %v1532_v41 = vmax.f32 %v1516_v13, 0.0 }
 0x2a8   : > { %v1210_v42 = vpop.f32.mrf.mxu3 }
 0x2a9   : > { %v1543_v43 = vpack.c.bf16 %v1532_v41, %v1531_v38  ;;  %v1472_v8 = vpop.f32.mrf.mxu2  ;;  %v1332_v19 = vadd.f32 %v1331_v30, %v1210_v42  ;;  %v2174_v30 = vunpack.c.l.bf16 %v2200_v33 }
 0x2aa   : > { %v1333_v22 = vpop.f32.mrf.mxu1 }
 0x2ab   : > { %2111 = vmatmul.msk.bf16.gmra.mxu0 %vm864_vm3, %v1543_v43  ;;  %v1497_v35 = vadd.f32 %v1472_v8, %v1332_v19  ;;  %v2175_v8 = vunpack.c.h.bf16 %v2200_v33 }
 0x2ad   : > { %v1517_v16 = vadd.f32 %v3389_v23, %v1497_v35 }
 0x2af   : > { %v1533_v59 = vmax.f32 %v1517_v16, 0.0 }
 0x2b0   : > { %v1212_v32 = vpop.f32.mrf.mxu3 }
 0x2b1   : > { %v1334_v20 = vadd.f32 %v1333_v22, %v1212_v32  ;;  %v1474_v11 = vpop.f32.mrf.mxu2  ;;  %v2201_v32 = vld [vmem:[%s2999_s26 + $0x10] sm:$0xff]  }
 0x2b2   : > { %v1336_v37 = vpop.f32.mrf.mxu1  ;;  %v2178_v16 = vunpack.c.l.bf16 %v2201_v32 }
 0x2b3   : > { %v1498_v25 = vadd.f32 %v1474_v11, %v1334_v20 }
 0x2b5   : > { %v1518_v51 = vadd.f32 %v3389_v23, %v1498_v25 }
 0x2b7   : > { %v1534_v44 = vmax.f32 %v1518_v51, 0.0 }
 0x2b8   : > { %v1215_v45 = vpop.f32.mrf.mxu3 }
 0x2b9   : > { %v1544_v48 = vpack.c.bf16 %v1534_v44, %v1533_v59  ;;  %v1477_v49 = vpop.f32.mrf.mxu2  ;;  %v1337_v0 = vadd.f32 %v1336_v37, %v1215_v45  ;;  %v2179_v45 = vunpack.c.h.bf16 %v2201_v32 }
 0x2ba   : > { %v1338_v50 = vpop.f32.mrf.mxu1 }
 0x2bb   : > { %2112 = vmatmul.msk.bf16.gmra.mxu0 %vm864_vm3, %v1544_v48  ;;  %v1499_v12 = vadd.f32 %v1477_v49, %v1337_v0 }
 0x2bd   : > { %v1519_v54 = vadd.f32 %v3389_v23, %v1499_v12 }
 0x2bf   : > { %v1535_v58 = vmax.f32 %v1519_v54, 0.0 }
 0x2c0   : > { %v1217_v52 = vpop.f32.mrf.mxu3 }
 0x2c1   : > { %v1339_v28 = vadd.f32 %v1338_v50, %v1217_v52  ;;  %v1479_v53 = vpop.f32.mrf.mxu2  ;;  %v2202_v50 = vld [vmem:[%s2999_s26 + $0x18] sm:$0xff]  }
 0x2c2   : > { %v1341_v39 = vpop.f32.mrf.mxu1 }
 0x2c3   : > { %v1500_v55 = vadd.f32 %v1479_v53, %v1339_v28  ;;  %v2182_v28 = vunpack.c.l.bf16 %v2202_v50 }
 0x2c5   : > { %v1520_v57 = vadd.f32 %v3389_v23, %v1500_v55 }
 0x2c7   : > { %v1536_v34 = vmax.f32 %v1520_v57, 0.0 }
 0x2c8   : > { %v1220_v60 = vpop.f32.mrf.mxu3 }
 0x2c9   : > { %v1545_v1 = vpack.c.bf16 %v1536_v34, %v1535_v58  ;;  %v1482_v2 = vpop.f32.mrf.mxu2  ;;  %v1342_v36 = vadd.f32 %v1341_v39, %v1220_v60  ;;  %v2183_v58 = vunpack.c.h.bf16 %v2202_v50 }
 0x2ca   : > { %v1343_v21 = vpop.f32.mrf.mxu1 }
 0x2cb   : > { %2113 = vmatmul.msk.bf16.gmra.mxu0 %vm864_vm3, %v1545_v1  ;;  %v1501_v5 = vadd.f32 %v1482_v2, %v1342_v36  ;;  %v2203_v2 = vld [vmem:[%s2999_s26 + $0x20] sm:$0xff]  }
 0x2cd   : > { %v1521_v6 = vadd.f32 %v3389_v23, %v1501_v5 }
 0x2cf   : > { %v1537_v9 = vmax.f32 %v1521_v6, 0.0 }
 0x2d0   : > { %v1222_v46 = vpop.f32.mrf.mxu3 }
 0x2d1   : > { %v1344_v62 = vadd.f32 %v1343_v21, %v1222_v46  ;;  %v1484_v61 = vpop.f32.mrf.mxu2  ;;  %v2186_v21 = vunpack.c.l.bf16 %v2203_v2 }
 0x2d3   : > { %v1502_v47 = vadd.f32 %v1484_v61, %v1344_v62 }
 0x2d5   : > { %v1522_v7 = vadd.f32 %v3389_v23, %v1502_v47 }
 0x2d7   : > { %v1538_v40 = vmax.f32 %v1522_v7, 0.0  ;;  %v2187_v7 = vunpack.c.h.bf16 %v2203_v2 }
 0x2d9   : > { %v1546_v14 = vpack.c.bf16 %v1538_v40, %v1537_v9 }
 0x2db   : > { %2114 = vmatmul.msk.bf16.gmra.mxu0 %vm864_vm3, %v1546_v14 }
 0x2e8   : > { %v1589_v17 = vpop.f32.mrf.mxu0 }
 0x2e9   : > { %v1590_v56 = vadd.f32 %v3419_v63, %v1589_v17 }
 0x2eb   : > { %v1661_v15 = vadd.f32 %v2170_v10, %v1590_v56  ;;  %v2190_v56 = vunpack.c.l.bf16 %v2204_v4 }
 0x2ed   : > { %v1677_v23 = vmax.f32 %v1661_v15, 0.0 }
 0x2ef   : > { %v1693_v18 = vpack.c.bf16 %v1677_v23, %v1677_v23 }
 0x2f0   : > { %v1591_v29 = vpop.f32.mrf.mxu0 }
 0x2f1   : > { %1710 = vst.msk [vmem:[%s3333_s6] sm:$0xf] %vm1709_vm9, %v1693_v18  ;;  %v1592_v31 = vadd.f32 %v3419_v63, %v1591_v29 }
 0x2f3   : > { %v1662_v27 = vadd.f32 %v2171_v3, %v1592_v31  ;;  %v2191_v31 = vunpack.c.h.bf16 %v2204_v4 }
 0x2f5   : > { %v1678_v24 = vmax.f32 %v1662_v27, 0.0 }
 0x2f7   : > { %v1694_v26 = vpack.c.bf16 %v1678_v24, %v1678_v24 }
 0x2f8   : > { %v1594_v13 = vpop.f32.mrf.mxu0 }
 0x2f9   : > { %1711 = vst.msk [vmem:[%s3333_s6 + $0x4] sm:$0xf] %vm1709_vm9, %v1694_v26  ;;  %v1595_v38 = vadd.f32 %v3419_v63, %v1594_v13  ;;  %v2205_v26 = vld [vmem:[%s2999_s26 + $0x30] sm:$0xff]  }
 0x2fb   : > { %v1663_v41 = vadd.f32 %v2174_v30, %v1595_v38  ;;  %v2194_v38 = vunpack.c.l.bf16 %v2205_v26 }
 0x2fd   : > { %v1679_v42 = vmax.f32 %v1663_v41, 0.0 }
 0x2ff   : > { %v1695_v43 = vpack.c.bf16 %v1679_v42, %v1679_v42 }
 0x300   : > { %v1596_v19 = vpop.f32.mrf.mxu0 }
 0x301   : > { %1712 = vst.msk [vmem:[%s3333_s6 + $0x8] sm:$0xf] %vm1709_vm9, %v1695_v43  ;;  %v1597_v22 = vadd.f32 %v3419_v63, %v1596_v19 }
 0x303   : > { %v1664_v35 = vadd.f32 %v2175_v8, %v1597_v22  ;;  %v2195_v22 = vunpack.c.h.bf16 %v2205_v26 }
 0x305   : > { %v1680_v20 = vmax.f32 %v1664_v35, 0.0 }
 0x307   : > { %v1696_v11 = vpack.c.bf16 %v1680_v20, %v1680_v20 }
 0x308   : > { %v1599_v25 = vpop.f32.mrf.mxu0 }
 0x309   : > { %1713 = vst.msk [vmem:[%s3333_s6 + $0xc] sm:$0xf] %vm1709_vm9, %v1696_v11  ;;  %v1600_v37 = vadd.f32 %v3419_v63, %v1599_v25  ;;  %v2206_v11 = vld [vmem:[%s2999_s26 + $0x38] sm:$0xff]  }
 0x30b   : > { %v1665_v51 = vadd.f32 %v2178_v16, %v1600_v37  ;;  %v2198_v37 = vunpack.c.l.bf16 %v2206_v11 }
 0x30d   : > { %v1681_v59 = vmax.f32 %v1665_v51, 0.0 }
 0x30f   : > { %v1697_v44 = vpack.c.bf16 %v1681_v59, %v1681_v59 }
 0x310   : > { %v1601_v48 = vpop.f32.mrf.mxu0 }
 0x311   : > { %1714 = vst.msk [vmem:[%s3333_s6 + $0x10] sm:$0xf] %vm1709_vm9, %v1697_v44  ;;  %v1602_v49 = vadd.f32 %v3419_v63, %v1601_v48 }
 0x313   : > { %v1666_v0 = vadd.f32 %v2179_v45, %v1602_v49  ;;  %v2199_v49 = vunpack.c.h.bf16 %v2206_v11 }
 0x315   : > { %v1682_v12 = vmax.f32 %v1666_v0, 0.0 }
 0x317   : > { %v1698_v52 = vpack.c.bf16 %v1682_v12, %v1682_v12 }
 0x318   : > { %v1604_v53 = vpop.f32.mrf.mxu0 }
 0x319   : > { %1715 = vst.msk [vmem:[%s3333_s6 + $0x14] sm:$0xf] %vm1709_vm9, %v1698_v52  ;;  %v1605_v54 = vadd.f32 %v3419_v63, %v1604_v53 }
 0x31b   : > { %v1667_v55 = vadd.f32 %v2182_v28, %v1605_v54 }
 0x31d   : > { %v1683_v57 = vmax.f32 %v1667_v55, 0.0 }
 0x31f   : > { %v1699_v39 = vpack.c.bf16 %v1683_v57, %v1683_v57 }
 0x320   : > { %v1606_v34 = vpop.f32.mrf.mxu0 }
 0x321   : > { %1716 = vst.msk [vmem:[%s3333_s6 + $0x18] sm:$0xf] %vm1709_vm9, %v1699_v39  ;;  %v1607_v60 = vadd.f32 %v3419_v63, %v1606_v34 }
 0x323   : > { %v1668_v1 = vadd.f32 %v2183_v58, %v1607_v60 }
 0x325   : > { %v1684_v36 = vmax.f32 %v1668_v1, 0.0 }
 0x327   : > { %v1700_v5 = vpack.c.bf16 %v1684_v36, %v1684_v36 }
 0x328   : > { %v1609_v46 = vpop.f32.mrf.mxu0 }
 0x329   : > { %1717 = vst.msk [vmem:[%s3333_s6 + $0x1c] sm:$0xf] %vm1709_vm9, %v1700_v5  ;;  %v1610_v62 = vadd.f32 %v3419_v63, %v1609_v46 }
 0x32b   : > { %v1669_v61 = vadd.f32 %v2186_v21, %v1610_v62 }
 0x32d   : > { %v1685_v6 = vmax.f32 %v1669_v61, 0.0 }
 0x32f   : > { %v1701_v47 = vpack.c.bf16 %v1685_v6, %v1685_v6 }
 0x330   : > { %v1611_v9 = vpop.f32.mrf.mxu0 }
 0x331   : > { %1718 = vst.msk [vmem:[%s3333_s6 + $0x20] sm:$0xf] %vm1709_vm9, %v1701_v47  ;;  %v1612_v40 = vadd.f32 %v3419_v63, %v1611_v9 }
 0x333   : > { %v1670_v14 = vadd.f32 %v2187_v7, %v1612_v40 }
 0x335   : > { %v1686_v10 = vmax.f32 %v1670_v14, 0.0 }
 0x337   : > { %v1702_v17 = vpack.c.bf16 %v1686_v10, %v1686_v10 }
 0x338   : > { %v1614_v15 = vpop.f32.mrf.mxu0 }
 0x339   : > { %1719 = vst.msk [vmem:[%s3333_s6 + $0x24] sm:$0xf] %vm1709_vm9, %v1702_v17  ;;  %v1615_v23 = vadd.f32 %v3419_v63, %v1614_v15 }
 0x33b   : > { %v1671_v18 = vadd.f32 %v2190_v56, %v1615_v23 }
 0x33d   : > { %v1687_v3 = vmax.f32 %v1671_v18, 0.0 }
 0x33f   : > { %v1703_v29 = vpack.c.bf16 %v1687_v3, %v1687_v3 }
 0x340   : > { %v1616_v27 = vpop.f32.mrf.mxu0 }
 0x341   : > { %1720 = vst.msk [vmem:[%s3333_s6 + $0x28] sm:$0xf] %vm1709_vm9, %v1703_v29  ;;  %v1617_v33 = vadd.f32 %v3419_v63, %v1616_v27 }
 0x343   : > { %v1672_v24 = vadd.f32 %v2191_v31, %v1617_v33 }
 0x345   : > { %v1688_v30 = vmax.f32 %v1672_v24, 0.0 }
 0x347   : > { %v1704_v13 = vpack.c.bf16 %v1688_v30, %v1688_v30 }
 0x348   : > { %v1619_v41 = vpop.f32.mrf.mxu0 }
 0x349   : > { %1721 = vst.msk [vmem:[%s3333_s6 + $0x2c] sm:$0xf] %vm1709_vm9, %v1704_v13  ;;  %v1620_v42 = vadd.f32 %v3419_v63, %v1619_v41 }
 0x34b   : > { %v1673_v43 = vadd.f32 %v2194_v38, %v1620_v42 }
 0x34d   : > { %v1689_v8 = vmax.f32 %v1673_v43, 0.0 }
 0x34f   : > { %v1705_v19 = vpack.c.bf16 %v1689_v8, %v1689_v8 }
 0x350   : > { %v1621_v35 = vpop.f32.mrf.mxu0 }
 0x351   : > { %1722 = vst.msk [vmem:[%s3333_s6 + $0x30] sm:$0xf] %vm1709_vm9, %v1705_v19  ;;  %v1622_v32 = vadd.f32 %v3419_v63, %v1621_v35 }
 0x353   : > { %v1674_v20 = vadd.f32 %v2195_v22, %v1622_v32 }
 0x355   : > { %v1690_v16 = vmax.f32 %v1674_v20, 0.0 }
 0x357   : > { %v1706_v25 = vpack.c.bf16 %v1690_v16, %v1690_v16 }
 0x358   : > { %v1624_v51 = vpop.f32.mrf.mxu0 }
 0x359   : > { %1723 = vst.msk [vmem:[%s3333_s6 + $0x34] sm:$0xf] %vm1709_vm9, %v1706_v25  ;;  %v1625_v59 = vadd.f32 %v3419_v63, %v1624_v51 }
 0x35b   : > { %v1675_v44 = vadd.f32 %v2198_v37, %v1625_v59 }
 0x35d   : > { %v1691_v45 = vmax.f32 %v1675_v44, 0.0 }
 0x35f   : > { %v1707_v48 = vpack.c.bf16 %v1691_v45, %v1691_v45 }
 0x360   : > { %v1626_v0 = vpop.f32.mrf.mxu0 }
 0x361   : > { %1724 = vst.msk [vmem:[%s3333_s6 + $0x38] sm:$0xf] %vm1709_vm9, %v1707_v48  ;;  %v1627_v50 = vadd.f32 %v3419_v63, %v1626_v0 }
 0x363   : > { %v1676_v12 = vadd.f32 %v2199_v49, %v1627_v50 }
 0x365   : > { %v1692_v52 = vmax.f32 %v1676_v12, 0.0 }
 0x367   : > { %v1708_v28 = vpack.c.bf16 %v1692_v52, %v1692_v52 }
 0x369   : > { %1725 = vst.msk [vmem:[%s3333_s6 + $0x3c] sm:$0xf] %vm1709_vm9, %v1708_v28 }
 0x36a   : > { %2572 = shalt.err (!%p2569_p12)
}
 0x36b   : > { %s2707_s25 = smov 64  }
 0x36c   : > { %2215 = dma.vmem_to_hbm [thread:$0]  (%p2929_p4), %s1743_s12, 1024, %s1745_s28, %s1727_s3, %s2707_s25, %s2707_s25, %s2703_s4  }
 0x36d PF: > { %s3625_s6 = sld [smem:[#allocation15_spill]]  ;;  %p2232_p13 = scmp.ge.s32.totalorder %s2699_s22, 2 }
 0x36f   : > { %p2228_p1 = pnand %p2232_p13, %p2933_p6 }
 0x371   : > { %p2229_p2 = pneg %p2228_p1 }
 0x373   : > { %s1759_s7 = sand.u32 1, %s3625_s6  }
 0x374   : > { %s1760_s18 = scalar_lea.sflag [#allocation5], %s1759_s7 }
 0x375   : > { %2642 = dma.done.wait (%p2229_p2), %s1760_s18, 1024  }
 0x376   : > { %2644 = vsyncadd (%p2229_p2), %s1760_s18, 4294966272  ;;  %s28_s22 = sadd.s32 1, %s2699_s22   ;;  %s3628_s8 = sld [smem:[#allocation14_spill]] }
 0x377   : > { %p3499_p11 = scmp.ge.s32.totalorder %s28_s22, 6   ;;  %s3629_s14 = sld [smem:[#allocation24_spill]] }
 0x378   : > { %s3630_s4 = sld [smem:[#allocation16_spill]]  ;;  %s3636_s30 = smov %s2651_s10 }
 0x379   : > { %s3631_s17 = sld [smem:[#allocation25_spill]]  ;;  %s3637_s10 = smov %s2655_s11 }
 0x37a   : > { %s3632_s18 = sld [smem:[#allocation19_spill]]  ;;  %s3638_s11 = smov %s2976_s29 }
 0x37b   : > { %s3633_s19 = sld [smem:[#allocation20_spill]]  ;;  %s3639_s12 = smov %s2663_s13 }
 0x37c   : > { %s3634_s20 = sld [smem:[#allocation21_spill]]  ;;  %s3640_s13 = smov %s3628_s8 }
 0x37d   : > { %s3635_s21 = sld [smem:[#allocation22_spill]]  ;;  %s3641_s15 = smov %s2675_s16 }
 0x37e   : > { %s3642_s16 = smov %s3630_s4  ;;  %27 = sbr.rel (!%p3499_p11) target bundleno = 22 (0x16), region = 138 }
 0x383   :  { %1766 = vsyncpa [#allocation4], 1 }
 0x384   :  { %1768 = vsyncpa [#allocation4 + $0x1], 1 }
 0x385   :  { %1769 = vsyncpa [#allocation7], 1 }
 0x386   :  { %1771 = vsyncpa [#allocation7 + $0x1], 1 }
 0x387   :  { %1772 = vsyncpa [#allocation5], 1 }
 0x388   :  { %1774 = vsyncpa [#allocation5 + $0x1], 1 }

</bundles_post_ra>
